<compile_context>
chip_gen: v7x
topology: tpu7x:2x2x1
jax: 0.10.0
libtpu: 0.0.40
codegen_flags: <defaults>
</compile_context>

<pallas_src>
import math
import functools

import jax
import jax.numpy as jnp
from jax import lax
from jax.experimental import pallas as pl
from jax.experimental.pallas import tpu as pltpu


def pairwise_attention_head_kernel(x_ref, wq_ref, bq_ref, wk_ref, bk_ref,
                                   wv_ref, bv_ref, pb_ref, wo_ref, bo_ref,
                                   gamma_ref, beta_ref,
                                   out_ref, attn_ref,
                                   o_acc,
                                   *, eps):
    """One (batch, head) grid step.

    Every in-kernel tensor is produced and stored lane-dense: per-head weight
    blocks come from BlockSpec (no in-kernel column slicing), and the output
    projection is accumulated into a full-width (N, F) f32 scratch.
    """
    h = pl.program_id(1)

    xb = x_ref[0].astype(jnp.bfloat16)                      # (N, F) MXU operand

    # Per-head projections (1/sqrt(head_dim) already folded into wq / bq).
    # bf16 MXU operands, f32 accumulation; cast to bf16 exactly once.
    q = (jnp.dot(xb, wq_ref[0], preferred_element_type=jnp.float32)
         + bq_ref[0]).astype(jnp.bfloat16)                  # (N, hd)
    k = (jnp.dot(xb, wk_ref[0], preferred_element_type=jnp.float32)
         + bk_ref[0]).astype(jnp.bfloat16)
    v = (jnp.dot(xb, wv_ref[0], preferred_element_type=jnp.float32)
         + bv_ref[0]).astype(jnp.bfloat16)

    # Scores: contract head_dim of both operands (no k.T materialized).
    s = lax.dot_general(q, k, (((1,), (1,)), ((), ())),
                        preferred_element_type=jnp.float32) + pb_ref[...]

    # Softmax over keys (f32); approx reciprocal runs on the EUP slot.
    m = jnp.max(s, axis=-1, keepdims=True)
    p = jnp.exp(s - m)
    a = p * pl.reciprocal(jnp.sum(p, axis=-1, keepdims=True), approx=True)
    attn_ref[0, 0] = a.astype(attn_ref.dtype)               # full-block store
    # TODO(synk): attention-weight dropout omitted (eval mode => identity).

    # Head contribution to the output projection — lane-dense over full F.
    ov = jnp.dot(a.astype(jnp.bfloat16), v, preferred_element_type=jnp.float32)
    contrib = jnp.dot(ov.astype(jnp.bfloat16), wo_ref[0],
                      preferred_element_type=jnp.float32)   # (N, F)

    @pl.when(h == 0)
    def _():
        o_acc[...] = jnp.zeros_like(o_acc)

    o_acc[...] += contrib

    # Finalize on the last head: bias, residual, (identity) dropout, LayerNorm.
    @pl.when(h == pl.num_programs(1) - 1)
    def _():
        y = x_ref[0].astype(jnp.float32) + o_acc[...] + bo_ref[...]
        mu = jnp.mean(y, axis=-1, keepdims=True)
        var = jnp.mean((y - mu) ** 2, axis=-1, keepdims=True)
        y = (y - mu) * lax.rsqrt(var + eps)
        y = y * gamma_ref[...] + beta_ref[...]
        out_ref[0] = y.astype(out_ref.dtype)


def _vmem_limit_bytes():
    # ~75% of physical VMEM, capped at 100 MiB:
    #   v5e/v6e (128 MiB physical) -> 96 MiB;  v7x (64 MiB physical) -> 48 MiB.
    try:
        cap = pltpu.get_tpu_info().vmem_capacity_bytes
    except Exception:
        cap = 64 * 1024 * 1024          # conservative (v7x-sized) fallback
    return min((cap * 3) // 4, 100 * 1024 * 1024)


def improved_pairwise_attention(x, params, heads, attn_dtype=jnp.bfloat16):
    """Forward pass. Returns (out [B,N,F], attn [B,heads,N,N]).

    attn is emitted in bf16 by default (attn writeback dominates HBM traffic
    at realistic N); pass attn_dtype=jnp.float32 for exact-parity inspection.
    """
    B, N, F = x.shape
    hd = F // heads
    assert hd * heads == F, "feature_dim must be divisible by heads"
    assert N <= F, "num_features must be <= feature_dim (pair_bias is (F, F))"

    scale = 1.0 / math.sqrt(hd)

    def head_cols(w):            # (F, F) -> (heads, F, hd): per-head columns
        return jnp.transpose(w.reshape(F, heads, hd), (1, 0, 2))

    # bf16 weights (half the weight DMA), head-major so BlockSpec can feed one
    # head's (F, hd) columns / (hd, F) rows per grid step. Scale folded into Q.
    wq = head_cols(params["wq"] * scale).astype(jnp.bfloat16)     # (H, F, hd)
    wk = head_cols(params["wk"]).astype(jnp.bfloat16)
    wv = head_cols(params["wv"]).astype(jnp.bfloat16)
    wo = params["wo"].reshape(heads, hd, F).astype(jnp.bfloat16)  # (H, hd, F)
    bq = (params["bq"] * scale).reshape(heads, 1, hd)             # f32
    bk = params["bk"].reshape(heads, 1, hd)
    bv = params["bv"].reshape(heads, 1, hd)
    bo = params["bo"]                                             # (1, F)
    pb = params["pair_bias"][:N, :N].astype(jnp.float32)          # (N, N)
    gamma, beta = params["gamma"], params["beta"]                 # (1, F)

    kernel = functools.partial(pairwise_attention_head_kernel, eps=1e-5)

    def call(single_buffer_consts):
        # Inputs whose block index never changes across the grid do not need
        # double-buffering; single-buffer them when pipeline_mode is supported.
        const_kw = ({"pipeline_mode": pl.Buffered(1)}
                    if single_buffer_consts else {})

        def const(shape):
            nd = len(shape)
            return pl.BlockSpec(shape, lambda b, h, _nd=nd: (0,) * _nd,
                                **const_kw)

        def per_head(shape):
            return pl.BlockSpec(shape, lambda b, h: (h, 0, 0))

        # TODO(synk): for large N/F add a query-tile grid axis (scores on
        # (tq, N) tiles), K-tile the projections, and pad the trailing output
        # dims to multiples of 128; unnecessary at these demo shapes.
        return pl.pallas_call(
            kernel,
            out_shape=(
                jax.ShapeDtypeStruct((B, N, F), x.dtype),
                jax.ShapeDtypeStruct((B, heads, N, N), attn_dtype),
            ),
            grid=(B, heads),
            in_specs=[
                pl.BlockSpec((1, N, F), lambda b, h: (b, 0, 0)),   # x
                per_head((1, F, hd)), per_head((1, 1, hd)),        # wq, bq
                per_head((1, F, hd)), per_head((1, 1, hd)),        # wk, bk
                per_head((1, F, hd)), per_head((1, 1, hd)),        # wv, bv
                const((N, N)),                                     # pair_bias
                per_head((1, hd, F)),                              # wo
                const((1, F)),                                     # bo
                const((1, F)), const((1, F)),                      # gamma, beta
            ],
            out_specs=(
                pl.BlockSpec((1, N, F), lambda b, h: (b, 0, 0)),
                pl.BlockSpec((1, 1, N, N), lambda b, h: (b, h, 0, 0)),
            ),
            scratch_shapes=[pltpu.VMEM((N, F), jnp.float32)],      # out-proj acc
            compiler_params=pltpu.CompilerParams(
                dimension_semantics=("parallel", "arbitrary"),
                vmem_limit_bytes=_vmem_limit_bytes()),
        )(x, wq, bq, wk, bk, wv, bv, pb, wo, bo, gamma, beta)

    try:
        return call(True)
    except Exception:
        # pipeline_mode=pl.Buffered(1) unsupported on this jax/libtpu combo;
        # fall back to default double-buffering for the constant inputs.
        return call(False)


def reference_forward(x, params, heads):
    """Pure-JAX f32 reference mirroring the PyTorch module (eval mode)."""
    B, N, F = x.shape
    hd = F // heads
    q = x @ params["wq"] + params["bq"][0]
    k = x @ params["wk"] + params["bk"][0]
    v = x @ params["wv"] + params["bv"][0]
    q = q.reshape(B, N, heads, hd).transpose(0, 2, 1, 3)
    k = k.reshape(B, N, heads, hd).transpose(0, 2, 1, 3)
    v = v.reshape(B, N, heads, hd).transpose(0, 2, 1, 3)
    attn = jnp.einsum("bhqd,bhkd->bhqk", q, k) / math.sqrt(hd)
    attn = attn + params["pair_bias"][None, None, :N, :N]
    attn = jax.nn.softmax(attn, axis=-1)
    out = jnp.einsum("bhqk,bhkd->bhqd", attn, v)
    out = out.transpose(0, 2, 1, 3).reshape(B, N, F)
    out = out @ params["wo"] + params["bo"][0]
    y = x + out
    mu = jnp.mean(y, axis=-1, keepdims=True)
    var = jnp.mean((y - mu) ** 2, axis=-1, keepdims=True)
    y = (y - mu) / jnp.sqrt(var + 1e-5)
    y = y * params["gamma"][0] + params["beta"][0]
    return y, attn


def make_params(key, feature_dim):
    """Deterministic synthetic parameters (module __init__ shapes)."""
    ks = jax.random.split(key, 10)
    s = 1.0 / math.sqrt(feature_dim)

    def lin(kw, kb):
        # stored as (in, out), i.e. torch weight (out, in) transposed
        w = jax.random.uniform(kw, (feature_dim, feature_dim), jnp.float32, -s, s)
        b = jax.random.uniform(kb, (1, feature_dim), jnp.float32, -s, s)
        return w, b

    wq, bq = lin(ks[0], ks[1])
    wk, bk = lin(ks[2], ks[3])
    wv, bv = lin(ks[4], ks[5])
    wo, bo = lin(ks[6], ks[7])
    # nn.Parameter(torch.zeros(F, F)) — use small nonzero values so the
    # pair-bias path is actually exercised.
    pair_bias = 0.1 * jax.random.normal(ks[8], (feature_dim, feature_dim),
                                        jnp.float32)
    gamma = jnp.ones((1, feature_dim), jnp.float32)   # LayerNorm weight
    beta = jnp.zeros((1, feature_dim), jnp.float32)   # LayerNorm bias
    return dict(wq=wq, bq=bq, wk=wk, bk=bk, wv=wv, bv=bv,
                wo=wo, bo=bo, pair_bias=pair_bias, gamma=gamma, beta=beta)


if __name__ == "__main__":
    B, N, F, H = 2, 8, 32, 4   # batch, num_features, feature_dim, heads

    key = jax.random.PRNGKey(0)
    kx, kp = jax.random.split(key)
    x = jax.random.normal(kx, (B, N, F), jnp.float32)
    params = make_params(kp, F)

    out, attn = improved_pairwise_attention(x, params, heads=H)
    out = jax.block_until_ready(out)
    attn = jax.block_until_ready(attn)

    out_ref, attn_ref = reference_forward(x, params, heads=H)
    assert out.shape == (B, N, F) and attn.shape == (B, H, N, N)
    # bf16 matmul operands + bf16 attn output + approx reciprocal => loose tol.
    attn_f32 = attn.astype(jnp.float32)
    assert jnp.allclose(attn_f32, attn_ref, atol=2e-2, rtol=2e-2), \
        float(jnp.max(jnp.abs(attn_f32 - attn_ref)))
    assert jnp.allclose(out, out_ref, atol=5e-2, rtol=5e-2), \
        float(jnp.max(jnp.abs(out - out_ref)))

    print("KERNEL_OK")
</pallas_src>

<mosaic_0001>
module attributes {stable_mosaic.version = 11 : i64} {
  func.func @pairwise_attention_head_kernel(%arg0: i32, %arg1: i32, %arg2: memref<1x8x32xf32, #tpu.memory_space<vmem>>, %arg3: memref<1x32x8xbf16, #tpu.memory_space<vmem>>, %arg4: memref<1x1x8xf32, #tpu.memory_space<vmem>>, %arg5: memref<1x32x8xbf16, #tpu.memory_space<vmem>>, %arg6: memref<1x1x8xf32, #tpu.memory_space<vmem>>, %arg7: memref<1x32x8xbf16, #tpu.memory_space<vmem>>, %arg8: memref<1x1x8xf32, #tpu.memory_space<vmem>>, %arg9: memref<8x8xf32, #tpu.memory_space<vmem>>, %arg10: memref<1x8x32xbf16, #tpu.memory_space<vmem>>, %arg11: memref<1x32xf32, #tpu.memory_space<vmem>>, %arg12: memref<1x32xf32, #tpu.memory_space<vmem>>, %arg13: memref<1x32xf32, #tpu.memory_space<vmem>>, %arg14: memref<1x8x32xf32, #tpu.memory_space<vmem>>, %arg15: memref<1x1x8x8xbf16, #tpu.memory_space<vmem>>, %arg16: memref<8x32xf32, #tpu.memory_space<vmem>>) attributes {dimension_semantics = [#tpu.dimension_semantics<parallel>, #tpu.dimension_semantics<arbitrary>], iteration_bounds = array<i64: 2, 4>, scalar_prefetch = 0 : i64, scratch_operands = 1 : i64, tpu.core_type = #tpu.core_type<tc>, window_params = [{transform_indices = @transform_0, window_bounds = array<i64: 1, 8, 32>}, {transform_indices = @transform_1, window_bounds = array<i64: 1, 32, 8>}, {transform_indices = @transform_2, window_bounds = array<i64: 1, 1, 8>}, {transform_indices = @transform_3, window_bounds = array<i64: 1, 32, 8>}, {transform_indices = @transform_4, window_bounds = array<i64: 1, 1, 8>}, {transform_indices = @transform_5, window_bounds = array<i64: 1, 32, 8>}, {transform_indices = @transform_6, window_bounds = array<i64: 1, 1, 8>}, {pipeline_mode = #tpu.pipeline_mode<synchronous>, transform_indices = @transform_7, window_bounds = array<i64: 8, 8>}, {transform_indices = @transform_8, window_bounds = array<i64: 1, 8, 32>}, {pipeline_mode = #tpu.pipeline_mode<synchronous>, transform_indices = @transform_9, window_bounds = array<i64: 1, 32>}, {pipeline_mode = #tpu.pipeline_mode<synchronous>, transform_indices = @transform_10, window_bounds = array<i64: 1, 32>}, {pipeline_mode = #tpu.pipeline_mode<synchronous>, transform_indices = @transform_11, window_bounds = array<i64: 1, 32>}, {transform_indices = @transform_12, window_bounds = array<i64: 1, 8, 32>}, {transform_indices = @transform_13, window_bounds = array<i64: 1, 1, 8, 8>}]} {
    %c0 = arith.constant 0 : index
    %c0_0 = arith.constant 0 : index
    %c0_1 = arith.constant 0 : index
    %0 = vector.load %arg2[%c0, %c0_0, %c0_1] : memref<1x8x32xf32, #tpu.memory_space<vmem>>, vector<1x8x32xf32>
    %1 = vector.shape_cast %0 : vector<1x8x32xf32> to vector<8x32xf32>
    %2 = arith.truncf %1 : vector<8x32xf32> to vector<8x32xbf16>
    %c0_2 = arith.constant 0 : index
    %c0_3 = arith.constant 0 : index
    %c0_4 = arith.constant 0 : index
    %3 = vector.load %arg3[%c0_2, %c0_3, %c0_4] : memref<1x32x8xbf16, #tpu.memory_space<vmem>>, vector<1x32x8xbf16>
    %4 = vector.shape_cast %3 : vector<1x32x8xbf16> to vector<32x8xbf16>
    %cst = arith.constant dense<0.000000e+00> : vector<8x8xf32>
    %5 = tpu.matmul %2, %4, %cst {dimension_numbers = #tpu.dot_dimension_numbers<[1], [0], [0], [1], [0, 0, 1, 1], [], []>} : vector<8x32xbf16>, vector<32x8xbf16>, vector<8x8xf32> -> vector<8x8xf32>
    %c0_5 = arith.constant 0 : index
    %c0_6 = arith.constant 0 : index
    %c0_7 = arith.constant 0 : index
    %6 = vector.load %arg4[%c0_5, %c0_6, %c0_7] : memref<1x1x8xf32, #tpu.memory_space<vmem>>, vector<1x1x8xf32>
    %7 = vector.shape_cast %6 : vector<1x1x8xf32> to vector<1x8xf32>
    %8 = vector.broadcast %7 : vector<1x8xf32> to vector<8x8xf32>
    %9 = arith.addf %5, %8 : vector<8x8xf32>
    %10 = arith.truncf %9 : vector<8x8xf32> to vector<8x8xbf16>
    %c0_8 = arith.constant 0 : index
    %c0_9 = arith.constant 0 : index
    %c0_10 = arith.constant 0 : index
    %11 = vector.load %arg5[%c0_8, %c0_9, %c0_10] : memref<1x32x8xbf16, #tpu.memory_space<vmem>>, vector<1x32x8xbf16>
    %12 = vector.shape_cast %11 : vector<1x32x8xbf16> to vector<32x8xbf16>
    %cst_11 = arith.constant dense<0.000000e+00> : vector<8x8xf32>
    %13 = tpu.matmul %2, %12, %cst_11 {dimension_numbers = #tpu.dot_dimension_numbers<[1], [0], [0], [1], [0, 0, 1, 1], [], []>} : vector<8x32xbf16>, vector<32x8xbf16>, vector<8x8xf32> -> vector<8x8xf32>
    %c0_12 = arith.constant 0 : index
    %c0_13 = arith.constant 0 : index
    %c0_14 = arith.constant 0 : index
    %14 = vector.load %arg6[%c0_12, %c0_13, %c0_14] : memref<1x1x8xf32, #tpu.memory_space<vmem>>, vector<1x1x8xf32>
    %15 = vector.shape_cast %14 : vector<1x1x8xf32> to vector<1x8xf32>
    %16 = vector.broadcast %15 : vector<1x8xf32> to vector<8x8xf32>
    %17 = arith.addf %13, %16 : vector<8x8xf32>
    %18 = arith.truncf %17 : vector<8x8xf32> to vector<8x8xbf16>
    %c0_15 = arith.constant 0 : index
    %c0_16 = arith.constant 0 : index
    %c0_17 = arith.constant 0 : index
    %19 = vector.load %arg7[%c0_15, %c0_16, %c0_17] : memref<1x32x8xbf16, #tpu.memory_space<vmem>>, vector<1x32x8xbf16>
    %20 = vector.shape_cast %19 : vector<1x32x8xbf16> to vector<32x8xbf16>
    %cst_18 = arith.constant dense<0.000000e+00> : vector<8x8xf32>
    %21 = tpu.matmul %2, %20, %cst_18 {dimension_numbers = #tpu.dot_dimension_numbers<[1], [0], [0], [1], [0, 0, 1, 1], [], []>} : vector<8x32xbf16>, vector<32x8xbf16>, vector<8x8xf32> -> vector<8x8xf32>
    %c0_19 = arith.constant 0 : index
    %c0_20 = arith.constant 0 : index
    %c0_21 = arith.constant 0 : index
    %22 = vector.load %arg8[%c0_19, %c0_20, %c0_21] : memref<1x1x8xf32, #tpu.memory_space<vmem>>, vector<1x1x8xf32>
    %23 = vector.shape_cast %22 : vector<1x1x8xf32> to vector<1x8xf32>
    %24 = vector.broadcast %23 : vector<1x8xf32> to vector<8x8xf32>
    %25 = arith.addf %21, %24 : vector<8x8xf32>
    %26 = arith.truncf %25 : vector<8x8xf32> to vector<8x8xbf16>
    %cst_22 = arith.constant dense<0.000000e+00> : vector<8x8xf32>
    %27 = tpu.matmul %10, %18, %cst_22 {dimension_numbers = #tpu.dot_dimension_numbers<[1], [1], [0], [0], [0, 0, 1, 0], [], []>} : vector<8x8xbf16>, vector<8x8xbf16>, vector<8x8xf32> -> vector<8x8xf32>
    %c0_23 = arith.constant 0 : index
    %c0_24 = arith.constant 0 : index
    %28 = vector.load %arg9[%c0_23, %c0_24] : memref<8x8xf32, #tpu.memory_space<vmem>>, vector<8x8xf32>
    %29 = arith.addf %27, %28 : vector<8x8xf32>
    %cst_25 = arith.constant dense<0xFF800000> : vector<8xf32>
    %30 = vector.multi_reduction <maximumf>, %29, %cst_25 [1] : vector<8x8xf32> to vector<8xf32>
    %31 = vector.shape_cast %30 : vector<8xf32> to vector<8x1xf32>
    %32 = vector.broadcast %31 : vector<8x1xf32> to vector<8x8xf32>
    %33 = arith.subf %29, %32 : vector<8x8xf32>
    %34 = math.exp %33 : vector<8x8xf32>
    %cst_26 = arith.constant dense<0.000000e+00> : vector<8xf32>
    %35 = vector.multi_reduction <add>, %34, %cst_26 [1] : vector<8x8xf32> to vector<8xf32>
    %36 = vector.shape_cast %35 : vector<8xf32> to vector<8x1xf32>
    %37 = tpu.reciprocal %36 {approx = true} : vector<8x1xf32> -> vector<8x1xf32>
    %38 = vector.broadcast %37 : vector<8x1xf32> to vector<8x8xf32>
    %39 = arith.mulf %34, %38 : vector<8x8xf32>
    %40 = arith.truncf %39 : vector<8x8xf32> to vector<8x8xbf16>
    %c0_27 = arith.constant 0 : index
    %c0_28 = arith.constant 0 : index
    %c0_29 = arith.constant 0 : index
    %c0_30 = arith.constant 0 : index
    %41 = vector.load %arg15[%c0_27, %c0_28, %c0_29, %c0_30] : memref<1x1x8x8xbf16, #tpu.memory_space<vmem>>, vector<1x1x8x8xbf16>
    %42 = vector.shape_cast %41 : vector<1x1x8x8xbf16> to vector<8x8xbf16>
    %43 = vector.shape_cast %40 : vector<8x8xbf16> to vector<1x1x8x8xbf16>
    tpu.vector_store %arg15[%c0_27, %c0_28, %c0_29, %c0_30], %43 {strides = array<i32>} : memref<1x1x8x8xbf16, #tpu.memory_space<vmem>>, vector<1x1x8x8xbf16>,
    %44 = arith.truncf %39 : vector<8x8xf32> to vector<8x8xbf16>
    %cst_31 = arith.constant dense<0.000000e+00> : vector<8x8xf32>
    %45 = tpu.matmul %44, %26, %cst_31 {dimension_numbers = #tpu.dot_dimension_numbers<[1], [0], [0], [1], [0, 0, 1, 1], [], []>} : vector<8x8xbf16>, vector<8x8xbf16>, vector<8x8xf32> -> vector<8x8xf32>
    %46 = arith.truncf %45 : vector<8x8xf32> to vector<8x8xbf16>
    %c0_32 = arith.constant 0 : index
    %c0_33 = arith.constant 0 : index
    %c0_34 = arith.constant 0 : index
    %47 = vector.load %arg10[%c0_32, %c0_33, %c0_34] : memref<1x8x32xbf16, #tpu.memory_space<vmem>>, vector<1x8x32xbf16>
    %48 = vector.shape_cast %47 : vector<1x8x32xbf16> to vector<8x32xbf16>
    %cst_35 = arith.constant dense<0.000000e+00> : vector<8x32xf32>
    %49 = tpu.matmul %46, %48, %cst_35 {dimension_numbers = #tpu.dot_dimension_numbers<[1], [0], [0], [1], [0, 0, 1, 1], [], []>} : vector<8x8xbf16>, vector<8x32xbf16>, vector<8x32xf32> -> vector<8x32xf32>
    %c0_i32 = arith.constant 0 : i32
    %50 = arith.cmpi eq, %arg1, %c0_i32 : i32
    %51 = arith.extui %50 : i1 to i32
    %c0_i32_36 = arith.constant 0 : i32
    %52 = arith.cmpi ne, %51, %c0_i32_36 : i32
    scf.if %52 {
      %cst_42 = arith.constant 0.000000e+00 : f32
      %59 = vector.broadcast %cst_42 : f32 to vector<8x32xf32>
      %c0_43 = arith.constant 0 : index
      %c0_44 = arith.constant 0 : index
      %60 = vector.load %arg16[%c0_43, %c0_44] : memref<8x32xf32, #tpu.memory_space<vmem>>, vector<8x32xf32>
      tpu.vector_store %arg16[%c0_43, %c0_44], %59 {strides = array<i32>} : memref<8x32xf32, #tpu.memory_space<vmem>>, vector<8x32xf32>,
    } else {
    }
    %c0_37 = arith.constant 0 : index
    %c0_38 = arith.constant 0 : index
    %53 = vector.load %arg16[%c0_37, %c0_38] : memref<8x32xf32, #tpu.memory_space<vmem>>, vector<8x32xf32>
    %54 = arith.addf %53, %49 : vector<8x32xf32>
    %c0_39 = arith.constant 0 : index
    %c0_40 = arith.constant 0 : index
    %55 = vector.load %arg16[%c0_39, %c0_40] : memref<8x32xf32, #tpu.memory_space<vmem>>, vector<8x32xf32>
    tpu.vector_store %arg16[%c0_39, %c0_40], %54 {strides = array<i32>} : memref<8x32xf32, #tpu.memory_space<vmem>>, vector<8x32xf32>,
    %c3_i32 = arith.constant 3 : i32
    %56 = arith.cmpi eq, %arg1, %c3_i32 : i32
    %57 = arith.extui %56 : i1 to i32
    %c0_i32_41 = arith.constant 0 : i32
    %58 = arith.cmpi ne, %57, %c0_i32_41 : i32
    scf.if %58 {
      %c0_42 = arith.constant 0 : index
      %c0_43 = arith.constant 0 : index
      %c0_44 = arith.constant 0 : index
      %59 = vector.load %arg2[%c0_42, %c0_43, %c0_44] : memref<1x8x32xf32, #tpu.memory_space<vmem>>, vector<1x8x32xf32>
      %60 = vector.shape_cast %59 : vector<1x8x32xf32> to vector<8x32xf32>
      %c0_45 = arith.constant 0 : index
      %c0_46 = arith.constant 0 : index
      %61 = vector.load %arg16[%c0_45, %c0_46] : memref<8x32xf32, #tpu.memory_space<vmem>>, vector<8x32xf32>
      %62 = arith.addf %60, %61 : vector<8x32xf32>
      %c0_47 = arith.constant 0 : index
      %c0_48 = arith.constant 0 : index
      %63 = vector.load %arg11[%c0_47, %c0_48] : memref<1x32xf32, #tpu.memory_space<vmem>>, vector<1x32xf32>
      %64 = vector.broadcast %63 : vector<1x32xf32> to vector<8x32xf32>
      %65 = arith.addf %62, %64 : vector<8x32xf32>
      %cst_49 = arith.constant dense<0.000000e+00> : vector<8xf32>
      %66 = vector.multi_reduction <add>, %65, %cst_49 [1] : vector<8x32xf32> to vector<8xf32>
      %67 = vector.shape_cast %66 : vector<8xf32> to vector<8x1xf32>
      %cst_50 = arith.constant 3.200000e+01 : f32
      %68 = vector.broadcast %cst_50 : f32 to vector<8x1xf32>
      %69 = arith.divf %67, %68 : vector<8x1xf32>
      %70 = vector.broadcast %69 : vector<8x1xf32> to vector<8x32xf32>
      %71 = arith.subf %65, %70 : vector<8x32xf32>
      %72 = arith.mulf %71, %71 : vector<8x32xf32>
      %cst_51 = arith.constant dense<0.000000e+00> : vector<8xf32>
      %73 = vector.multi_reduction <add>, %72, %cst_51 [1] : vector<8x32xf32> to vector<8xf32>
      %74 = vector.shape_cast %73 : vector<8xf32> to vector<8x1xf32>
      %cst_52 = arith.constant 3.200000e+01 : f32
      %75 = vector.broadcast %cst_52 : f32 to vector<8x1xf32>
      %76 = arith.divf %74, %75 : vector<8x1xf32>
      %77 = vector.broadcast %69 : vector<8x1xf32> to vector<8x32xf32>
      %78 = arith.subf %65, %77 : vector<8x32xf32>
      %cst_53 = arith.constant 9.99999974E-6 : f32
      %79 = vector.broadcast %cst_53 : f32 to vector<8x1xf32>
      %80 = arith.addf %76, %79 : vector<8x1xf32>
      %81 = math.rsqrt %80 : vector<8x1xf32>
      %82 = vector.broadcast %81 : vector<8x1xf32> to vector<8x32xf32>
      %83 = arith.mulf %78, %82 : vector<8x32xf32>
      %c0_54 = arith.constant 0 : index
      %c0_55 = arith.constant 0 : index
      %84 = vector.load %arg12[%c0_54, %c0_55] : memref<1x32xf32, #tpu.memory_space<vmem>>, vector<1x32xf32>
      %85 = vector.broadcast %84 : vector<1x32xf32> to vector<8x32xf32>
      %86 = arith.mulf %83, %85 : vector<8x32xf32>
      %c0_56 = arith.constant 0 : index
      %c0_57 = arith.constant 0 : index
      %87 = vector.load %arg13[%c0_56, %c0_57] : memref<1x32xf32, #tpu.memory_space<vmem>>, vector<1x32xf32>
      %88 = vector.broadcast %87 : vector<1x32xf32> to vector<8x32xf32>
      %89 = arith.addf %86, %88 : vector<8x32xf32>
      %c0_58 = arith.constant 0 : index
      %c0_59 = arith.constant 0 : index
      %c0_60 = arith.constant 0 : index
      %90 = vector.load %arg14[%c0_58, %c0_59, %c0_60] : memref<1x8x32xf32, #tpu.memory_space<vmem>>, vector<1x8x32xf32>
      %91 = vector.shape_cast %90 : vector<1x8x32xf32> to vector<8x32xf32>
      %92 = vector.shape_cast %89 : vector<8x32xf32> to vector<1x8x32xf32>
      tpu.vector_store %arg14[%c0_58, %c0_59, %c0_60], %92 {strides = array<i32>} : memref<1x8x32xf32, #tpu.memory_space<vmem>>, vector<1x8x32xf32>,
    } else {
    }
    return
  }
  func.func @transform_0(%arg0: i32, %arg1: i32) -> (i32, i32, i32) {
    %c0_i32 = arith.constant 0 : i32
    %c0_i32_0 = arith.constant 0 : i32
    %c0_i32_1 = arith.constant 0 : i32
    return %arg0, %c0_i32, %c0_i32_0 : i32, i32, i32
  }
  func.func @transform_1(%arg0: i32, %arg1: i32) -> (i32, i32, i32) {
    %c0_i32 = arith.constant 0 : i32
    %c0_i32_0 = arith.constant 0 : i32
    %c0_i32_1 = arith.constant 0 : i32
    return %arg1, %c0_i32, %c0_i32_0 : i32, i32, i32
  }
  func.func @transform_2(%arg0: i32, %arg1: i32) -> (i32, i32, i32) {
    %c0_i32 = arith.constant 0 : i32
    %c0_i32_0 = arith.constant 0 : i32
    %c0_i32_1 = arith.constant 0 : i32
    return %arg1, %c0_i32, %c0_i32_0 : i32, i32, i32
  }
  func.func @transform_3(%arg0: i32, %arg1: i32) -> (i32, i32, i32) {
    %c0_i32 = arith.constant 0 : i32
    %c0_i32_0 = arith.constant 0 : i32
    %c0_i32_1 = arith.constant 0 : i32
    return %arg1, %c0_i32, %c0_i32_0 : i32, i32, i32
  }
  func.func @transform_4(%arg0: i32, %arg1: i32) -> (i32, i32, i32) {
    %c0_i32 = arith.constant 0 : i32
    %c0_i32_0 = arith.constant 0 : i32
    %c0_i32_1 = arith.constant 0 : i32
    return %arg1, %c0_i32, %c0_i32_0 : i32, i32, i32
  }
  func.func @transform_5(%arg0: i32, %arg1: i32) -> (i32, i32, i32) {
    %c0_i32 = arith.constant 0 : i32
    %c0_i32_0 = arith.constant 0 : i32
    %c0_i32_1 = arith.constant 0 : i32
    return %arg1, %c0_i32, %c0_i32_0 : i32, i32, i32
  }
  func.func @transform_6(%arg0: i32, %arg1: i32) -> (i32, i32, i32) {
    %c0_i32 = arith.constant 0 : i32
    %c0_i32_0 = arith.constant 0 : i32
    %c0_i32_1 = arith.constant 0 : i32
    return %arg1, %c0_i32, %c0_i32_0 : i32, i32, i32
  }
  func.func @transform_7(%arg0: i32, %arg1: i32) -> (i32, i32) {
    %c0_i32 = arith.constant 0 : i32
    %c0_i32_0 = arith.constant 0 : i32
    %c0_i32_1 = arith.constant 0 : i32
    return %c0_i32, %c0_i32_0 : i32, i32
  }
  func.func @transform_8(%arg0: i32, %arg1: i32) -> (i32, i32, i32) {
    %c0_i32 = arith.constant 0 : i32
    %c0_i32_0 = arith.constant 0 : i32
    %c0_i32_1 = arith.constant 0 : i32
    return %arg1, %c0_i32, %c0_i32_0 : i32, i32, i32
  }
  func.func @transform_9(%arg0: i32, %arg1: i32) -> (i32, i32) {
    %c0_i32 = arith.constant 0 : i32
    %c0_i32_0 = arith.constant 0 : i32
    %c0_i32_1 = arith.constant 0 : i32
    return %c0_i32, %c0_i32_0 : i32, i32
  }
  func.func @transform_10(%arg0: i32, %arg1: i32) -> (i32, i32) {
    %c0_i32 = arith.constant 0 : i32
    %c0_i32_0 = arith.constant 0 : i32
    %c0_i32_1 = arith.constant 0 : i32
    return %c0_i32, %c0_i32_0 : i32, i32
  }
  func.func @transform_11(%arg0: i32, %arg1: i32) -> (i32, i32) {
    %c0_i32 = arith.constant 0 : i32
    %c0_i32_0 = arith.constant 0 : i32
    %c0_i32_1 = arith.constant 0 : i32
    return %c0_i32, %c0_i32_0 : i32, i32
  }
  func.func @transform_12(%arg0: i32, %arg1: i32) -> (i32, i32, i32) {
    %c0_i32 = arith.constant 0 : i32
    %c0_i32_0 = arith.constant 0 : i32
    %c0_i32_1 = arith.constant 0 : i32
    return %arg0, %c0_i32, %c0_i32_0 : i32, i32, i32
  }
  func.func @transform_13(%arg0: i32, %arg1: i32) -> (i32, i32, i32, i32) {
    %c0_i32 = arith.constant 0 : i32
    %c0_i32_0 = arith.constant 0 : i32
    %c0_i32_1 = arith.constant 0 : i32
    return %arg0, %arg1, %c0_i32, %c0_i32_0 : i32, i32, i32, i32
  }
}

module attributes {stable_mosaic.version = 11 : i64} {
  func.func @pairwise_attention_head_kernel(%arg0: i32, %arg1: i32, %arg2: memref<1x8x32xf32, #tpu.memory_space<vmem>>, %arg3: memref<1x32x8xbf16, #tpu.memory_space<vmem>>, %arg4: memref<1x1x8xf32, #tpu.memory_space<vmem>>, %arg5: memref<1x32x8xbf16, #tpu.memory_space<vmem>>, %arg6: memref<1x1x8xf32, #tpu.memory_space<vmem>>, %arg7: memref<1x32x8xbf16, #tpu.memory_space<vmem>>, %arg8: memref<1x1x8xf32, #tpu.memory_space<vmem>>, %arg9: memref<8x8xf32, #tpu.memory_space<vmem>>, %arg10: memref<1x8x32xbf16, #tpu.memory_space<vmem>>, %arg11: memref<1x32xf32, #tpu.memory_space<vmem>>, %arg12: memref<1x32xf32, #tpu.memory_space<vmem>>, %arg13: memref<1x32xf32, #tpu.memory_space<vmem>>, %arg14: memref<1x8x32xf32, #tpu.memory_space<vmem>>, %arg15: memref<1x1x8x8xbf16, #tpu.memory_space<vmem>>, %arg16: memref<8x32xf32, #tpu.memory_space<vmem>>) attributes {dimension_semantics = [#tpu.dimension_semantics<parallel>, #tpu.dimension_semantics<arbitrary>], iteration_bounds = array<i64: 2, 4>, scalar_prefetch = 0 : i64, scratch_operands = 1 : i64, tpu.core_type = #tpu.core_type<tc>, window_params = [{transform_indices = @transform_0, window_bounds = array<i64: 1, 8, 32>}, {transform_indices = @transform_1, window_bounds = array<i64: 1, 32, 8>}, {transform_indices = @transform_2, window_bounds = array<i64: 1, 1, 8>}, {transform_indices = @transform_3, window_bounds = array<i64: 1, 32, 8>}, {transform_indices = @transform_4, window_bounds = array<i64: 1, 1, 8>}, {transform_indices = @transform_5, window_bounds = array<i64: 1, 32, 8>}, {transform_indices = @transform_6, window_bounds = array<i64: 1, 1, 8>}, {pipeline_mode = #tpu.pipeline_mode<synchronous>, transform_indices = @transform_7, window_bounds = array<i64: 8, 8>}, {transform_indices = @transform_8, window_bounds = array<i64: 1, 8, 32>}, {pipeline_mode = #tpu.pipeline_mode<synchronous>, transform_indices = @transform_9, window_bounds = array<i64: 1, 32>}, {pipeline_mode = #tpu.pipeline_mode<synchronous>, transform_indices = @transform_10, window_bounds = array<i64: 1, 32>}, {pipeline_mode = #tpu.pipeline_mode<synchronous>, transform_indices = @transform_11, window_bounds = array<i64: 1, 32>}, {transform_indices = @transform_12, window_bounds = array<i64: 1, 8, 32>}, {transform_indices = @transform_13, window_bounds = array<i64: 1, 1, 8, 8>}]} {
    %c0 = arith.constant 0 : index
    %c0_0 = arith.constant 0 : index
    %c0_1 = arith.constant 0 : index
    %0 = vector.load %arg2[%c0, %c0_0, %c0_1] : memref<1x8x32xf32, #tpu.memory_space<vmem>>, vector<1x8x32xf32>
    %1 = vector.shape_cast %0 : vector<1x8x32xf32> to vector<8x32xf32>
    %2 = arith.truncf %1 : vector<8x32xf32> to vector<8x32xbf16>
    %c0_2 = arith.constant 0 : index
    %c0_3 = arith.constant 0 : index
    %c0_4 = arith.constant 0 : index
    %3 = vector.load %arg3[%c0_2, %c0_3, %c0_4] : memref<1x32x8xbf16, #tpu.memory_space<vmem>>, vector<1x32x8xbf16>
    %4 = vector.shape_cast %3 : vector<1x32x8xbf16> to vector<32x8xbf16>
    %cst = arith.constant dense<0.000000e+00> : vector<8x8xf32>
    %5 = tpu.matmul %2, %4, %cst {dimension_numbers = #tpu.dot_dimension_numbers<[1], [0], [0], [1], [0, 0, 1, 1], [], []>} : vector<8x32xbf16>, vector<32x8xbf16>, vector<8x8xf32> -> vector<8x8xf32>
    %c0_5 = arith.constant 0 : index
    %c0_6 = arith.constant 0 : index
    %c0_7 = arith.constant 0 : index
    %6 = vector.load %arg4[%c0_5, %c0_6, %c0_7] : memref<1x1x8xf32, #tpu.memory_space<vmem>>, vector<1x1x8xf32>
    %7 = vector.shape_cast %6 : vector<1x1x8xf32> to vector<1x8xf32>
    %8 = vector.broadcast %7 : vector<1x8xf32> to vector<8x8xf32>
    %9 = arith.addf %5, %8 : vector<8x8xf32>
    %10 = arith.truncf %9 : vector<8x8xf32> to vector<8x8xbf16>
    %c0_8 = arith.constant 0 : index
    %c0_9 = arith.constant 0 : index
    %c0_10 = arith.constant 0 : index
    %11 = vector.load %arg5[%c0_8, %c0_9, %c0_10] : memref<1x32x8xbf16, #tpu.memory_space<vmem>>, vector<1x32x8xbf16>
    %12 = vector.shape_cast %11 : vector<1x32x8xbf16> to vector<32x8xbf16>
    %cst_11 = arith.constant dense<0.000000e+00> : vector<8x8xf32>
    %13 = tpu.matmul %2, %12, %cst_11 {dimension_numbers = #tpu.dot_dimension_numbers<[1], [0], [0], [1], [0, 0, 1, 1], [], []>} : vector<8x32xbf16>, vector<32x8xbf16>, vector<8x8xf32> -> vector<8x8xf32>
    %c0_12 = arith.constant 0 : index
    %c0_13 = arith.constant 0 : index
    %c0_14 = arith.constant 0 : index
    %14 = vector.load %arg6[%c0_12, %c0_13, %c0_14] : memref<1x1x8xf32, #tpu.memory_space<vmem>>, vector<1x1x8xf32>
    %15 = vector.shape_cast %14 : vector<1x1x8xf32> to vector<1x8xf32>
    %16 = vector.broadcast %15 : vector<1x8xf32> to vector<8x8xf32>
    %17 = arith.addf %13, %16 : vector<8x8xf32>
    %18 = arith.truncf %17 : vector<8x8xf32> to vector<8x8xbf16>
    %c0_15 = arith.constant 0 : index
    %c0_16 = arith.constant 0 : index
    %c0_17 = arith.constant 0 : index
    %19 = vector.load %arg7[%c0_15, %c0_16, %c0_17] : memref<1x32x8xbf16, #tpu.memory_space<vmem>>, vector<1x32x8xbf16>
    %20 = vector.shape_cast %19 : vector<1x32x8xbf16> to vector<32x8xbf16>
    %cst_18 = arith.constant dense<0.000000e+00> : vector<8x8xf32>
    %21 = tpu.matmul %2, %20, %cst_18 {dimension_numbers = #tpu.dot_dimension_numbers<[1], [0], [0], [1], [0, 0, 1, 1], [], []>} : vector<8x32xbf16>, vector<32x8xbf16>, vector<8x8xf32> -> vector<8x8xf32>
    %c0_19 = arith.constant 0 : index
    %c0_20 = arith.constant 0 : index
    %c0_21 = arith.constant 0 : index
    %22 = vector.load %arg8[%c0_19, %c0_20, %c0_21] : memref<1x1x8xf32, #tpu.memory_space<vmem>>, vector<1x1x8xf32>
    %23 = vector.shape_cast %22 : vector<1x1x8xf32> to vector<1x8xf32>
    %24 = vector.broadcast %23 : vector<1x8xf32> to vector<8x8xf32>
    %25 = arith.addf %21, %24 : vector<8x8xf32>
    %26 = arith.truncf %25 : vector<8x8xf32> to vector<8x8xbf16>
    %cst_22 = arith.constant dense<0.000000e+00> : vector<8x8xf32>
    %27 = tpu.matmul %10, %18, %cst_22 {dimension_numbers = #tpu.dot_dimension_numbers<[1], [1], [0], [0], [0, 0, 1, 0], [], []>} : vector<8x8xbf16>, vector<8x8xbf16>, vector<8x8xf32> -> vector<8x8xf32>
    %c0_23 = arith.constant 0 : index
    %c0_24 = arith.constant 0 : index
    %28 = vector.load %arg9[%c0_23, %c0_24] : memref<8x8xf32, #tpu.memory_space<vmem>>, vector<8x8xf32>
    %29 = arith.addf %27, %28 : vector<8x8xf32>
    %cst_25 = arith.constant dense<0xFF800000> : vector<8xf32>
    %30 = vector.multi_reduction <maximumf>, %29, %cst_25 [1] : vector<8x8xf32> to vector<8xf32>
    %31 = vector.shape_cast %30 : vector<8xf32> to vector<8x1xf32>
    %32 = vector.broadcast %31 : vector<8x1xf32> to vector<8x8xf32>
    %33 = arith.subf %29, %32 : vector<8x8xf32>
    %34 = math.exp %33 : vector<8x8xf32>
    %cst_26 = arith.constant dense<0.000000e+00> : vector<8xf32>
    %35 = vector.multi_reduction <add>, %34, %cst_26 [1] : vector<8x8xf32> to vector<8xf32>
    %36 = vector.shape_cast %35 : vector<8xf32> to vector<8x1xf32>
    %37 = tpu.reciprocal %36 {approx = true} : vector<8x1xf32> -> vector<8x1xf32>
    %38 = vector.broadcast %37 : vector<8x1xf32> to vector<8x8xf32>
    %39 = arith.mulf %34, %38 : vector<8x8xf32>
    %40 = arith.truncf %39 : vector<8x8xf32> to vector<8x8xbf16>
    %c0_27 = arith.constant 0 : index
    %c0_28 = arith.constant 0 : index
    %c0_29 = arith.constant 0 : index
    %c0_30 = arith.constant 0 : index
    %41 = vector.load %arg15[%c0_27, %c0_28, %c0_29, %c0_30] : memref<1x1x8x8xbf16, #tpu.memory_space<vmem>>, vector<1x1x8x8xbf16>
    %42 = vector.shape_cast %41 : vector<1x1x8x8xbf16> to vector<8x8xbf16>
    %43 = vector.shape_cast %40 : vector<8x8xbf16> to vector<1x1x8x8xbf16>
    tpu.vector_store %arg15[%c0_27, %c0_28, %c0_29, %c0_30], %43 {strides = array<i32>} : memref<1x1x8x8xbf16, #tpu.memory_space<vmem>>, vector<1x1x8x8xbf16>,
    %44 = arith.truncf %39 : vector<8x8xf32> to vector<8x8xbf16>
    %cst_31 = arith.constant dense<0.000000e+00> : vector<8x8xf32>
    %45 = tpu.matmul %44, %26, %cst_31 {dimension_numbers = #tpu.dot_dimension_numbers<[1], [0], [0], [1], [0, 0, 1, 1], [], []>} : vector<8x8xbf16>, vector<8x8xbf16>, vector<8x8xf32> -> vector<8x8xf32>
    %46 = arith.truncf %45 : vector<8x8xf32> to vector<8x8xbf16>
    %c0_32 = arith.constant 0 : index
    %c0_33 = arith.constant 0 : index
    %c0_34 = arith.constant 0 : index
    %47 = vector.load %arg10[%c0_32, %c0_33, %c0_34] : memref<1x8x32xbf16, #tpu.memory_space<vmem>>, vector<1x8x32xbf16>
    %48 = vector.shape_cast %47 : vector<1x8x32xbf16> to vector<8x32xbf16>
    %cst_35 = arith.constant dense<0.000000e+00> : vector<8x32xf32>
    %49 = tpu.matmul %46, %48, %cst_35 {dimension_numbers = #tpu.dot_dimension_numbers<[1], [0], [0], [1], [0, 0, 1, 1], [], []>} : vector<8x8xbf16>, vector<8x32xbf16>, vector<8x32xf32> -> vector<8x32xf32>
    %c0_i32 = arith.constant 0 : i32
    %50 = arith.cmpi eq, %arg1, %c0_i32 : i32
    %51 = arith.extui %50 : i1 to i32
    %c0_i32_36 = arith.constant 0 : i32
    %52 = arith.cmpi ne, %51, %c0_i32_36 : i32
    scf.if %52 {
      %cst_42 = arith.constant 0.000000e+00 : f32
      %59 = vector.broadcast %cst_42 : f32 to vector<8x32xf32>
      %c0_43 = arith.constant 0 : index
      %c0_44 = arith.constant 0 : index
      %60 = vector.load %arg16[%c0_43, %c0_44] : memref<8x32xf32, #tpu.memory_space<vmem>>, vector<8x32xf32>
      tpu.vector_store %arg16[%c0_43, %c0_44], %59 {strides = array<i32>} : memref<8x32xf32, #tpu.memory_space<vmem>>, vector<8x32xf32>,
    } else {
    }
    %c0_37 = arith.constant 0 : index
    %c0_38 = arith.constant 0 : index
    %53 = vector.load %arg16[%c0_37, %c0_38] : memref<8x32xf32, #tpu.memory_space<vmem>>, vector<8x32xf32>
    %54 = arith.addf %53, %49 : vector<8x32xf32>
    %c0_39 = arith.constant 0 : index
    %c0_40 = arith.constant 0 : index
    %55 = vector.load %arg16[%c0_39, %c0_40] : memref<8x32xf32, #tpu.memory_space<vmem>>, vector<8x32xf32>
    tpu.vector_store %arg16[%c0_39, %c0_40], %54 {strides = array<i32>} : memref<8x32xf32, #tpu.memory_space<vmem>>, vector<8x32xf32>,
    %c3_i32 = arith.constant 3 : i32
    %56 = arith.cmpi eq, %arg1, %c3_i32 : i32
    %57 = arith.extui %56 : i1 to i32
    %c0_i32_41 = arith.constant 0 : i32
    %58 = arith.cmpi ne, %57, %c0_i32_41 : i32
    scf.if %58 {
      %c0_42 = arith.constant 0 : index
      %c0_43 = arith.constant 0 : index
      %c0_44 = arith.constant 0 : index
      %59 = vector.load %arg2[%c0_42, %c0_43, %c0_44] : memref<1x8x32xf32, #tpu.memory_space<vmem>>, vector<1x8x32xf32>
      %60 = vector.shape_cast %59 : vector<1x8x32xf32> to vector<8x32xf32>
      %c0_45 = arith.constant 0 : index
      %c0_46 = arith.constant 0 : index
      %61 = vector.load %arg16[%c0_45, %c0_46] : memref<8x32xf32, #tpu.memory_space<vmem>>, vector<8x32xf32>
      %62 = arith.addf %60, %61 : vector<8x32xf32>
      %c0_47 = arith.constant 0 : index
      %c0_48 = arith.constant 0 : index
      %63 = vector.load %arg11[%c0_47, %c0_48] : memref<1x32xf32, #tpu.memory_space<vmem>>, vector<1x32xf32>
      %64 = vector.broadcast %63 : vector<1x32xf32> to vector<8x32xf32>
      %65 = arith.addf %62, %64 : vector<8x32xf32>
      %cst_49 = arith.constant dense<0.000000e+00> : vector<8xf32>
      %66 = vector.multi_reduction <add>, %65, %cst_49 [1] : vector<8x32xf32> to vector<8xf32>
      %67 = vector.shape_cast %66 : vector<8xf32> to vector<8x1xf32>
      %cst_50 = arith.constant 3.200000e+01 : f32
      %68 = vector.broadcast %cst_50 : f32 to vector<8x1xf32>
      %69 = arith.divf %67, %68 : vector<8x1xf32>
      %70 = vector.broadcast %69 : vector<8x1xf32> to vector<8x32xf32>
      %71 = arith.subf %65, %70 : vector<8x32xf32>
      %72 = arith.mulf %71, %71 : vector<8x32xf32>
      %cst_51 = arith.constant dense<0.000000e+00> : vector<8xf32>
      %73 = vector.multi_reduction <add>, %72, %cst_51 [1] : vector<8x32xf32> to vector<8xf32>
      %74 = vector.shape_cast %73 : vector<8xf32> to vector<8x1xf32>
      %cst_52 = arith.constant 3.200000e+01 : f32
      %75 = vector.broadcast %cst_52 : f32 to vector<8x1xf32>
      %76 = arith.divf %74, %75 : vector<8x1xf32>
      %77 = vector.broadcast %69 : vector<8x1xf32> to vector<8x32xf32>
      %78 = arith.subf %65, %77 : vector<8x32xf32>
      %cst_53 = arith.constant 9.99999974E-6 : f32
      %79 = vector.broadcast %cst_53 : f32 to vector<8x1xf32>
      %80 = arith.addf %76, %79 : vector<8x1xf32>
      %81 = math.rsqrt %80 : vector<8x1xf32>
      %82 = vector.broadcast %81 : vector<8x1xf32> to vector<8x32xf32>
      %83 = arith.mulf %78, %82 : vector<8x32xf32>
      %c0_54 = arith.constant 0 : index
      %c0_55 = arith.constant 0 : index
      %84 = vector.load %arg12[%c0_54, %c0_55] : memref<1x32xf32, #tpu.memory_space<vmem>>, vector<1x32xf32>
      %85 = vector.broadcast %84 : vector<1x32xf32> to vector<8x32xf32>
      %86 = arith.mulf %83, %85 : vector<8x32xf32>
      %c0_56 = arith.constant 0 : index
      %c0_57 = arith.constant 0 : index
      %87 = vector.load %arg13[%c0_56, %c0_57] : memref<1x32xf32, #tpu.memory_space<vmem>>, vector<1x32xf32>
      %88 = vector.broadcast %87 : vector<1x32xf32> to vector<8x32xf32>
      %89 = arith.addf %86, %88 : vector<8x32xf32>
      %c0_58 = arith.constant 0 : index
      %c0_59 = arith.constant 0 : index
      %c0_60 = arith.constant 0 : index
      %90 = vector.load %arg14[%c0_58, %c0_59, %c0_60] : memref<1x8x32xf32, #tpu.memory_space<vmem>>, vector<1x8x32xf32>
      %91 = vector.shape_cast %90 : vector<1x8x32xf32> to vector<8x32xf32>
      %92 = vector.shape_cast %89 : vector<8x32xf32> to vector<1x8x32xf32>
      tpu.vector_store %arg14[%c0_58, %c0_59, %c0_60], %92 {strides = array<i32>} : memref<1x8x32xf32, #tpu.memory_space<vmem>>, vector<1x8x32xf32>,
    } else {
    }
    return
  }
  func.func @transform_0(%arg0: i32, %arg1: i32) -> (i32, i32, i32) {
    %c0_i32 = arith.constant 0 : i32
    %c0_i32_0 = arith.constant 0 : i32
    %c0_i32_1 = arith.constant 0 : i32
    return %arg0, %c0_i32, %c0_i32_0 : i32, i32, i32
  }
  func.func @transform_1(%arg0: i32, %arg1: i32) -> (i32, i32, i32) {
    %c0_i32 = arith.constant 0 : i32
    %c0_i32_0 = arith.constant 0 : i32
    %c0_i32_1 = arith.constant 0 : i32
    return %arg1, %c0_i32, %c0_i32_0 : i32, i32, i32
  }
  func.func @transform_2(%arg0: i32, %arg1: i32) -> (i32, i32, i32) {
    %c0_i32 = arith.constant 0 : i32
    %c0_i32_0 = arith.constant 0 : i32
    %c0_i32_1 = arith.constant 0 : i32
    return %arg1, %c0_i32, %c0_i32_0 : i32, i32, i32
  }
  func.func @transform_3(%arg0: i32, %arg1: i32) -> (i32, i32, i32) {
    %c0_i32 = arith.constant 0 : i32
    %c0_i32_0 = arith.constant 0 : i32
    %c0_i32_1 = arith.constant 0 : i32
    return %arg1, %c0_i32, %c0_i32_0 : i32, i32, i32
  }
  func.func @transform_4(%arg0: i32, %arg1: i32) -> (i32, i32, i32) {
    %c0_i32 = arith.constant 0 : i32
    %c0_i32_0 = arith.constant 0 : i32
    %c0_i32_1 = arith.constant 0 : i32
    return %arg1, %c0_i32, %c0_i32_0 : i32, i32, i32
  }
  func.func @transform_5(%arg0: i32, %arg1: i32) -> (i32, i32, i32) {
    %c0_i32 = arith.constant 0 : i32
    %c0_i32_0 = arith.constant 0 : i32
    %c0_i32_1 = arith.constant 0 : i32
    return %arg1, %c0_i32, %c0_i32_0 : i32, i32, i32
  }
  func.func @transform_6(%arg0: i32, %arg1: i32) -> (i32, i32, i32) {
    %c0_i32 = arith.constant 0 : i32
    %c0_i32_0 = arith.constant 0 : i32
    %c0_i32_1 = arith.constant 0 : i32
    return %arg1, %c0_i32, %c0_i32_0 : i32, i32, i32
  }
  func.func @transform_7(%arg0: i32, %arg1: i32) -> (i32, i32) {
    %c0_i32 = arith.constant 0 : i32
    %c0_i32_0 = arith.constant 0 : i32
    %c0_i32_1 = arith.constant 0 : i32
    return %c0_i32, %c0_i32_0 : i32, i32
  }
  func.func @transform_8(%arg0: i32, %arg1: i32) -> (i32, i32, i32) {
    %c0_i32 = arith.constant 0 : i32
    %c0_i32_0 = arith.constant 0 : i32
    %c0_i32_1 = arith.constant 0 : i32
    return %arg1, %c0_i32, %c0_i32_0 : i32, i32, i32
  }
  func.func @transform_9(%arg0: i32, %arg1: i32) -> (i32, i32) {
    %c0_i32 = arith.constant 0 : i32
    %c0_i32_0 = arith.constant 0 : i32
    %c0_i32_1 = arith.constant 0 : i32
    return %c0_i32, %c0_i32_0 : i32, i32
  }
  func.func @transform_10(%arg0: i32, %arg1: i32) -> (i32, i32) {
    %c0_i32 = arith.constant 0 : i32
    %c0_i32_0 = arith.constant 0 : i32
    %c0_i32_1 = arith.constant 0 : i32
    return %c0_i32, %c0_i32_0 : i32, i32
  }
  func.func @transform_11(%arg0: i32, %arg1: i32) -> (i32, i32) {
    %c0_i32 = arith.constant 0 : i32
    %c0_i32_0 = arith.constant 0 : i32
    %c0_i32_1 = arith.constant 0 : i32
    return %c0_i32, %c0_i32_0 : i32, i32
  }
  func.func @transform_12(%arg0: i32, %arg1: i32) -> (i32, i32, i32) {
    %c0_i32 = arith.constant 0 : i32
    %c0_i32_0 = arith.constant 0 : i32
    %c0_i32_1 = arith.constant 0 : i32
    return %arg0, %c0_i32, %c0_i32_0 : i32, i32, i32
  }
  func.func @transform_13(%arg0: i32, %arg1: i32) -> (i32, i32, i32, i32) {
    %c0_i32 = arith.constant 0 : i32
    %c0_i32_0 = arith.constant 0 : i32
    %c0_i32_1 = arith.constant 0 : i32
    return %arg0, %arg1, %c0_i32, %c0_i32_0 : i32, i32, i32, i32
  }
}

</mosaic_0001>

<bundles_post_ra>
// kernel: tpu_custom_call.1
= control target key start
LH: loop header
LB: loop body
LE: loop exit
PB: predicated region body
PF: predicated region fallthrough
CT: control target
= control target key end

     0   :  { %s1967_s0 = inlined_call_operand.vmem [shape: f32[2,8,32], index: 0, kind: input, shape index: {}]   ;;  %s1968_s1 = inlined_call_operand.vmem [shape: bf16[4,32,8], index: 1, kind: input, shape index: {}]   ;;  %s1969_s2 = inlined_call_operand.vmem [shape: f32[4,1,8], index: 2, kind: input, shape index: {}]   ;;  %s1970_s3 = inlined_call_operand.vmem [shape: bf16[4,32,8], index: 3, kind: input, shape index: {}]   ;;  %s1971_s4 = inlined_call_operand.vmem [shape: f32[4,1,8], index: 4, kind: input, shape index: {}]   ;;  %s1972_s5 = inlined_call_operand.vmem [shape: bf16[4,32,8], index: 5, kind: input, shape index: {}]   ;;  %s1973_s6 = inlined_call_operand.vmem [shape: f32[4,1,8], index: 6, kind: input, shape index: {}]   ;;  %s1974_s7 = inlined_call_operand.vmem [shape: f32[8,8], index: 7, kind: input, shape index: {}]   ;;  %s1975_s8 = inlined_call_operand.vmem [shape: bf16[4,8,32], index: 8, kind: input, shape index: {}]   ;;  %s1976_s9 = inlined_call_operand.vmem [shape: f32[1,32], index: 9, kind: input, shape index: {}]   ;;  %s1977_s10 = inlined_call_operand.vmem [shape: f32[1,32], index: 10, kind: input, shape index: {}]   ;;  %s1978_s11 = inlined_call_operand.vmem [shape: f32[1,32], index: 11, kind: input, shape index: {}]   ;;  %s1979_s12 = inlined_call_operand.hbm [shape: f32[2,8,32], index: 12, kind: output, shape index: {0}]   ;;  %s1980_s13 = inlined_call_operand.hbm [shape: bf16[2,4,8,8], index: 13, kind: output, shape index: {1}]  }
   0x1   :  { %1996 = sst [smem:[#allocation20_spill]] %s1967_s0 }
   0x2   :  { %1997 = sst [smem:[#allocation21_spill]] %s1968_s1 }
   0x3   :  { %1998 = sst [smem:[#allocation22_spill]] %s1969_s2 }
   0x4   :  { %1999 = sst [smem:[#allocation23_spill]] %s1976_s9 }
   0x5   :  { %2000 = sst [smem:[#allocation24_spill]] %s1977_s10 }
   0x6   :  { %2001 = sst [smem:[#allocation25_spill]] %s1978_s11 }
   0x7   :  { %2002 = sst [smem:[#allocation26_spill]] %s1979_s12 }
   0x8   :  { %2003 = sst [smem:[#allocation27_spill]] %s1980_s13 }
   0x9   :  { %19 = vsyncpa [#allocation4], 0 }
   0xa   :  { %21 = vsyncpa [#allocation4 + $0x1], 0 }
   0xb   :  { %22 = vsyncpa [#allocation6], 0 }
   0xc   :  { %24 = vsyncpa [#allocation6 + $0x1], 0  ;;  %s1647_s25 = smov 0   ;;  %s1649_s26 = smov 0  }
   0xd   :  { %s1651_s27 = smov 0   ;;  %s1653_s28 = smov 0  }
   0xe   :  { %s1655_s29 = smov 0   ;;  %s1657_s30 = smov 0  }
   0xf   :  { %s1659_s14 = smov 0   ;;  %s1661_s15 = smov 0  }
  0x10   :  { %s1663_s16 = smov 0   ;;  %s1665_s17 = smov 0  }
  0x11   :  { %s1667_s18 = smov 0  }
  0x12 LB: > { %2004 = sst [smem:[#allocation9_spill]] %s1538_s27  ;;  %s1203_s19 = sadd.s32 4294967295, %s1570_s18   ;;  %s1570_s18 = sphi %s1667_s18, %s30_s18   ;;  %s1566_s17 = sphi %s1665_s17, %s2043_s17   ;;  %s1562_s16 = sphi %s1663_s16, %s2042_s16   ;;  %s1558_s15 = sphi %s1661_s15, %s2041_s15   ;;  %s1554_s14 = sphi %s1659_s14, %s2040_s14   ;;  %s1550_s30 = sphi %s1657_s30, %s2039_s30   ;;  %s1546_s29 = sphi %s1655_s29, %s2047_s29   ;;  %s1542_s28 = sphi %s1653_s28, %s2046_s28   ;;  %s1538_s27 = sphi %s1651_s27, %s2037_s27   ;;  %s1534_s26 = sphi %s1649_s26, %s2045_s26   ;;  %s1530_s25 = sphi %s1647_s25, %s2044_s25  }
  0x13   : > { %2005 = sst [smem:[#allocation10_spill]] %s1542_s28  ;;  %s1204_s20 = sadd.s32 4294967294, %s1570_s18  }
  0x14   : > { %2006 = sst [smem:[#allocation11_spill]] %s1550_s30  ;;  %s39_s21 = sadd.s32 1, %s1562_s16 }
  0x15   : > { %2007 = sst [smem:[#allocation12_spill]] %s1562_s16  ;;  %s42_s22 = sadd.s32 1, %s1566_s17 }
  0x16   : > { %2008 = sst [smem:[#allocation13_spill]] %s1566_s17  ;;  %p40_p0 = scmp.ge.s32.totalorder %s39_s21, 4 }
  0x17   : > { %s341_s23 = sadd.s32 1, %s1550_s30  ;;  %p351_p1 = scmp.ne.s32.totalorder %s1550_s30, %s1546_s29 }
  0x18   : > { %p1709_p2 = scmp.eq.s32.totalorder %s1203_s19, 7  ;;  %s2049_s21 = smov (%p40_p0, %s39_s21), 0 }
  0x19   : > { %2010 = sst [smem:[#allocation14_spill]] %s2049_s21  ;;  %s2051_s22 = smov (!%p40_p0, %s42_s22), %s1566_s17 }
  0x1a   : > { %p1718_p3 = por %p1709_p2, %p351_p1  ;;  %p357_p4 = scmp.ne.s32.totalorder %s1546_s29, %s1542_s28 }
  0x1b   : > { %p44_p5 = scmp.ge.s32.totalorder %s2051_s22, 2  ;;  %p1724_p6 = scmp.eq.s32.totalorder %s1204_s20, 7 }
  0x1c   : > { %s2011_s13 = scalar_select %p1718_p3, 1, 0 }
  0x1d   : > { %s365_s12 = ssub.s32 %s1562_s16, %s2049_s21  ;;  %s369_s11 = sadd.s32 1, %s1538_s27 }
  0x1e   : > { %2012 = sst [smem:[#allocation15_spill]] %s2011_s13  ;;  %s2053_s22 = smov (%p44_p5, %s2051_s22), 0 }
  0x1f   : > { %2014 = sst [smem:[#allocation16_spill]] %s2053_s22  ;;  %p1735_p7 = por %p1724_p6, %p357_p4 }
  0x20   : > { %p379_p8 = scmp.ne.s32.totalorder %s1538_s27, %s1534_s26  ;;  %s338_s28 = ssub.s32 %s1566_s17, %s2053_s22 }
  0x21   : > { %p385_p9 = scmp.ne.s32.totalorder %s1534_s26, %s1530_s25  ;;  %p339_p10 = scmp.eq.s32.totalorder %s338_s28, 0 }
  0x22   : > { %s366_s20 = sor.u32 %s365_s12, %s338_s28  ;;  %p1747_p12 = por %p379_p8, %p1709_p2 }
  0x23   : > { %p367_p11 = scmp.eq.s32.totalorder %s366_s20, 0  ;;  %p1759_p13 = por %p385_p9, %p1724_p6 }
  0x24   : > { %s1752_s21 = scalar_select %p339_p10, %s1550_s30, %s341_s23  }
  0x25   : > { %s1755_s16 = scalar_select %p367_p11, %s1538_s27, %s369_s11  }
  0x26   : > { %2017 = sst [smem:[#allocation17_spill]] %s1752_s21  ;;  %p1207_p0 = scmp.ge.s32.totalorder %s1570_s18, 1 }
  0x27   : > { %2018 = sst [smem:[#allocation18_spill]] %s1755_s16  ;;  %p472_p1 = scmp.lt.s32.totalorder %s1570_s18, 9 }
  0x28   : > { %s2019_s9 = scalar_select %p1759_p13, 1, 0 }
  0x29   : > { %p473_p4 = pnand %p1207_p0, %p472_p1 }
  0x2a   : > { %2020 = sst [smem:[#allocation19_spill]] %s2019_s9  ;;  %p552_p2 = scmp.lt.s32.totalorder (!%p473_p4), %s1554_s14, 3  ;;  %v1572_v0 = vmov (!%p473_p4), 0.0   ;;  %vm1573_vm0 = vmmov (!%p473_p4), 0   ;;  %vm606_vm1 = vcmask (!%p473_p4), 261120   ;;  %vm780_vm2 = vcmask (!%p473_p4), 64512  }
  0x2b   : > { %476 = sbr.rel (%p473_p4) target bundleno = 1628 (0x65c), region = 68  ;;  %s1988_s12 = sand.u32 (!%p473_p4), 1, %s1546_s29   ;;  %1271 = vmatprep.subr.bf16.mxu1 (!%p473_p4), %v1572_v0  ;;  %1263 = vmatprep.subr.bf16.mxu0 (!%p473_p4), %v1572_v0  ;;  %v779_v24 = vld [vmem:[%s1974_s7] sm:$0xff] (!%p473_p4)  ;;  %vm844_vm3 = vcmask (!%p473_p4), 1043456   ;;  %vm839_vm4 = vcmask (!%p473_p4), 60416  }
  0x2c   : > { %s1770_s11 = sshll.u32 (!%p473_p4), %s1988_s12, 3  ;;  %1275 = vmatprep.mubr.msk.bf16.mxu1 (!%p473_p4), %vm1573_vm0, %v1572_v0  ;;  %1267 = vmatprep.mubr.msk.bf16.mxu0 (!%p473_p4), %vm1573_vm0, %v1572_v0  ;;  %p548_p5 = scmp.lt.s32.totalorder (!%p473_p4), %s1558_s15, 1 }
  0x2d   : > { %s2021_s1 = sld [smem:[#allocation21_spill]] (!%p473_p4)  ;;  %s2022_s0 = sld [smem:[#allocation20_spill]] (!%p473_p4) }
  0x2e   : > { %s2023_s2 = sld [smem:[#allocation22_spill]] (!%p473_p4)  ;;  %p1233_p6 = scmp.ne.s32.totalorder (!%p473_p4), %s1554_s14, 0 }
  0x32   : > { %s1774_s28 = scalar_select %p552_p2, %s1554_s14, 3 }
  0x33   : > { %s549_s21 = scalar_select %p548_p5, %s1558_s15, 1 }
  0x34   : > { %s1245_s23 = sshll.u32 %s1774_s28, 4  ;;  %s567_s16 = scalar_lea.vmem %s1971_s4, %s1774_s28  ;;  %v1574_v59 = vmov (!%p1233_p6), 0.0  }
  0x35   : > { %s564_s20 = scalar_lea.vmem %s1970_s3, %s1245_s23  ;;  %s556_s17 = scalar_lea.vmem %s2021_s1, %s1245_s23  ;;  %v1222_v7 = vld [vmem:[%s567_s16] ss:$0 sm:$0xff]  ;;  %940 = vst.msk [vmem:[#allocation2] sm:$0xff] (!%p1233_p6), %vm606_vm1, %v1574_v59 }
  0x36   : > { %v1408_v1 = vld [vmem:[%s564_s20] sm:$0xff]   ;;  %v1409_v2 = vld [vmem:[%s564_s20 + $0x8] sm:$0xff]   ;;  %s1792_s27 = scalar_lea.vmem %s1972_s5, %s1245_s23  ;;  %s1210_s9 = sshll.u32 %s549_s21, 3 }
  0x37   : > { %1272 = vmatpush3.bf16.msra.mxu1 %v1408_v1  ;;  %v1410_v3 = vld [vmem:[%s556_s17] sm:$0xff]   ;;  %v1411_v4 = vld [vmem:[%s556_s17 + $0x8] sm:$0xff]   ;;  %s1798_s22 = scalar_lea.vmem %s2022_s0, %s1210_s9  ;;  %s559_s12 = scalar_lea.vmem %s2023_s2, %s1774_s28 }
  0x38   : > { %1273 = vmatprep.subr.bf16.mxu1 %v1572_v0  ;;  %1264 = vmatpush3.bf16.msra.mxu0 %v1410_v3  ;;  %v581_v5 = vld [vmem:[%s1798_s22] sm:$0xff]  ;;  %v1413_v23 = vld [vmem:[%s1792_s27 + $0x8] sm:$0xff]   ;;  %s575_s19 = scalar_lea.vmem %s1973_s6, %s1774_s28  ;;  %s1217_s9 = sshll.u32 %s1774_s28, 2 }
  0x39   : > { %1265 = vmatprep.subr.bf16.mxu0 %v1572_v0  ;;  %v582_v6 = vpack.c.bf16 %v581_v5, %v581_v5  ;;  %v1218_v12 = vld [vmem:[%s559_s12] ss:$0 sm:$0xff]  ;;  %s579_s17 = scalar_lea.vmem %s1975_s8, %s1217_s9  ;;  %s1994_s21 = sand.u32 1, %s1534_s26  }
  0x3a   : > { %v1412_v22 = vld [vmem:[%s1792_s27] sm:$0xff]   ;;  %s1846_s12 = sshll.u32 %s1994_s21, 2  ;;  %s540_s23 = scalar_lea.vmem [#allocation3], %s1770_s11 }
  0x3b   : > { %1274 = vmatpush3.bf16.msra.mxu1 %v1409_v2  ;;  %v1226_v39 = vld [vmem:[%s575_s19] ss:$0 sm:$0xff]  ;;  %s1995_s28 = scalar_lea.vmem [#allocation5], %s1846_s12 }
  0x3c   : > { %1287 = vmatprep.subr.bf16.mxu1 %v1572_v0  ;;  %1266 = vmatpush3.bf16.msra.mxu0 %v1411_v4  ;;  %v889_v44 = vld [vmem:[%s579_s17] sm:$0xf] }
  0x3d   : > { %1279 = vmatprep.subr.bf16.mxu0 %v1572_v0  ;;  %v894_v45 = vsel %vm844_vm3, %v889_v44, 0 }
  0x3e   : > { %1276 = vmatmul.mubr.msk.bf16.vlgmr.msra.gmra.mrb[0].mxu1 %vm606_vm1, %v582_v6 }
  0x3f   : > { %1289 = vmatprep.mubr.msk.bf16.mxu1 %vm1573_vm0, %v1572_v0  ;;  %1268 = vmatmul.mubr.msk.bf16.vlgmr.msra.gmra.mrb[0].mxu0 %vm606_vm1, %v582_v6 }
  0x40   : > { %1283 = vmatprep.mubr.msk.bf16.mxu0 %vm1573_vm0, %v1572_v0  ;;  %1280 = vmatpush3.bf16.msra.mxu0 %v1412_v22 }
  0x41   : > { %1281 = vmatprep.subr.bf16.mxu0 %v1572_v0 }
  0x44   : > { %1282 = vmatpush3.bf16.msra.mxu0 %v1413_v23 }
  0x45   : > { %1293 = vmatprep.subr.bf16.mxu0 %v1572_v0 }
  0x47   : > { %1284 = vmatmul.mubr.msk.bf16.vlgmr.msra.gmra.mrb[4].mxu0 %vm606_vm1, %v582_v6 }
  0x48   : > { %1295 = vmatprep.mubr.msk.bf16.mxu0 %vm1573_vm0, %v1572_v0 }
 0x111   : > { %v708_v8 = vpop.f32.mrb[0].mxu1 }
 0x112   : > { %v709_v9 = vadd.f32 %v1222_v7, %v708_v8  ;;  %v1277_v10 = vpop.f32.mrb[1].mxu1  ;;  %v644_v13 = vpop.f32.mrb[0].mxu0 }
 0x113   : > { %v711_v11 = vpop.f32.mrb[2].mxu1  ;;  %v1269_v16 = vpop.f32.mrb[1].mxu0  ;;  %v645_v19 = vadd.f32 %v1218_v12, %v644_v13 }
 0x114   : > { %v714_v14 = vpack.c.bf16 %v709_v9, %v709_v9  ;;  %v1278_v15 = vpop.f32.mrb[3].mxu1  ;;  %v647_v17 = vpop.f32.mrb[2].mxu0 }
 0x115   : > { %v1270_v20 = vpop.f32.mrb[3].mxu0  ;;  %v650_v21 = vpack.c.bf16 %v645_v19, %v645_v19 }
 0x116   : > { %v785_v18 = vsel %vm780_vm2, %v714_v14, 0 }
 0x117   : > { %1288 = vmatpush3.bf16.xpose.msra.mxu1 %v785_v18 }
 0x118   : > { %1299 = vmatprep.subr.bf16.mxu1 %v1572_v0 }
 0x11a   : > { %v772_v36 = vpop.f32.mrb[4].mxu0 }
 0x11b   : > { %v1285_v37 = vpop.f32.mrb[5].mxu0  ;;  %v773_v41 = vadd.f32 %v1226_v39, %v772_v36 }
 0x11c   : > { %v775_v38 = vpop.f32.mrb[6].mxu0 }
 0x11d   : > { %v1286_v40 = vpop.f32.mrb[7].mxu0  ;;  %v778_v42 = vpack.c.bf16 %v773_v41, %v773_v41 }
 0x11e   : > { %1290 = vmatmul.mubr.msk.bf16.vlgmr.msra.gmra.mrb[4].mxu1 %vm780_vm2, %v650_v21 }
 0x11f   : > { %1301 = vmatprep.mubr.msk.bf16.mxu1 %vm1573_vm0, %v1572_v0  ;;  %v846_v43 = vsel %vm844_vm3, %v778_v42, 0  ;;  %1300 = vmatpush3.bf16.msra.mxu1 %v894_v45 }
 0x120   : > { %1294 = vmatpush3.bf16.msra.mxu0 %v846_v43 }
 0x1f1   : > { %v821_v25 = vpop.f32.mrb[4].mxu1 }
 0x1f2   : > { %v822_v26 = vadd.f32 %v821_v25, %v779_v24  ;;  %v1291_v27 = vpop.f32.mrb[5].mxu1 }
 0x1f3   : > { %v824_v28 = vpop.f32.mrb[6].mxu1 }
 0x1f4   : > { %v1292_v29 = vpop.f32.mrb[7].mxu1  ;;  %v827_v30 = vsel %vm780_vm2, %v822_v26, -inf }
 0x1f5   : > { %828 = vmax.xlane.f32.xlu0 %v827_v30 }
 0x282   : > { %v829_v31 = vpop.xlane.xlu0 %828 }
 0x283   : > { %v830_v32 = vsub.f32 %v822_v26, %v829_v31 }
 0x285   : > { %v831_v33 = vmul.f32 1.442695, %v830_v32 }
 0x287   : > { %1414 = vpow2.f32 %v831_v33 }
 0x291   : > { %v1415_v34 = vpop.eup %1414 }
 0x292   : > { %v833_v35 = vsel %vm780_vm2, %v1415_v34, 0.0 }
 0x293   : > { %834 = vadd.xlane.f32.xlu0 %v833_v35 }
 0x320   : > { %v835_v46 = vpop.xlane.xlu0 %834 }
 0x321   : > { %1416 = vrcp.f32 %v835_v46 }
 0x32b   : > { %v1417_v47 = vpop.eup %1416 }
 0x32c   : > { %v837_v48 = vmul.f32 %v1417_v47, %v1415_v34 }
 0x32e   : > { %v838_v49 = vpack.c.bf16 %v837_v48, %v837_v48 }
 0x330   : > { %840 = vst.msk [vmem:[%s1995_s28] sm:$0xf] %vm839_vm4, %v838_v49  ;;  %1296 = vmatmul.mubr.msk.bf16.vlgmr.msra.gmra.mrb[8].mxu0 %vm780_vm2, %v838_v49 }
 0x403   : > { %v882_v50 = vpop.f32.mrb[8].mxu0 }
 0x404   : > { %v888_v51 = vpack.c.bf16 %v882_v50, %v882_v50  ;;  %v1297_v52 = vpop.f32.mrb[9].mxu0 }
 0x405   : > { %v885_v53 = vpop.f32.mrb[10].mxu0 }
 0x406   : > { %v1298_v54 = vpop.f32.mrb[11].mxu0  ;;  %1302 = vmatmul.mubr.msk.bf16.vlgmr.msra.gmra.mrb[8].mxu1 %vm780_vm2, %v888_v51 }
 0x4d6   : > { %939 = sbr.rel (%p1233_p6) target bundleno = 1245 (0x4dd), region = 72 }
 0x4d9   : > { %v930_v55 = vpop.f32.mrb[8].mxu1 }
 0x4da   : > { %v1303_v56 = vpop.f32.mrb[9].mxu1 }
 0x4db   : > { %v933_v57 = vpop.f32.mrb[10].mxu1 }
 0x4dc   : > { %v1304_v58 = vpop.f32.mrb[11].mxu1 }
 0x4dd PF: > { %v941_v60 = vld [vmem:[#allocation2] sm:$0xff]  ;;  %p1234_p8 = scmp.ne.s32.totalorder %s1554_s14, 3 }
 0x4de   : > { %v942_v61 = vadd.f32 %v941_v60, %v930_v55  ;;  %v948_v62 = vld [vmem:[%s1798_s22] sm:$0xff] (!%p1234_p8)  ;;  %s2024_s24 = sld [smem:[#allocation23_spill]] (!%p1234_p8)  ;;  %s2025_s9 = sld [smem:[#allocation24_spill]] (!%p1234_p8) }
 0x4df   : > { %947 = sbr.rel (%p1234_p8) target bundleno = 1574 (0x626), region = 76  ;;  %s2026_s17 = sld [smem:[#allocation25_spill]] (!%p1234_p8) }
 0x4e0   : > { %943 = vst.msk [vmem:[#allocation2] sm:$0xff] %vm606_vm1, %v942_v61 }
 0x4e4   : > { %v1235_v0 = vld [vmem:[%s2024_s24] ss:$0 sm:$0xff] (!%p1234_p8) }
 0x4e5   : > { %v1236_v13 = vld [vmem:[%s2025_s9] ss:$0 sm:$0xff] (!%p1234_p8) }
 0x4e6   : > { %v1237_v15 = vld [vmem:[%s2026_s17] ss:$0 sm:$0xff] }
 0x4e7   : > { %v949_v63 = vld [vmem:[#allocation2] sm:$0xff] }
 0x4e8   : > { %v950_v1 = vadd.f32 %v949_v63, %v948_v62 }
 0x4ea   : > { %v958_v2 = vadd.f32 %v1235_v0, %v950_v1 }
 0x4ec   : > { %v959_v3 = vsel %vm606_vm1, %v958_v2, 0.0 }
 0x4ed   : > { %960 = vadd.xlane.f32.xlu0 %v959_v3 }
 0x57a   : > { %v961_v4 = vpop.xlane.xlu0 %960 }
 0x57b   : > { %v963_v5 = vmul.f32 0.03125, %v961_v4 }
 0x57d   : > { %v964_v6 = vsub.f32 %v958_v2, %v963_v5 }
 0x57f   : > { %v965_v7 = vmul.f32 %v964_v6, %v964_v6 }
 0x581   : > { %v966_v8 = vsel %vm606_vm1, %v965_v7, 0.0 }
 0x582   : > { %967 = vadd.xlane.f32.xlu0 %v966_v8 }
 0x60f   : > { %v968_v9 = vpop.xlane.xlu0 %967 }
 0x610   : > { %v969_v10 = vmul.f32 0.03125, %v968_v9 }
 0x612   : > { %v970_v11 = vadd.f32 1e-05, %v969_v10 }
 0x614   : > { %1418 = vrsqrt.f32 %v970_v11 }
 0x61e   : > { %v1419_v12 = vpop.eup %1418 }
 0x61f   : > { %v972_v14 = vmul.f32 %v1419_v12, %v964_v6 }
 0x621   : > { %v980_v16 = vmul.f32 %v1236_v13, %v972_v14 }
 0x623   : > { %v988_v17 = vadd.f32 %v1237_v15, %v980_v16 }
 0x625   : > { %989 = vst.msk [vmem:[%s540_s23] sm:$0xff] %vm606_vm1, %v988_v17 }
 0x626 PF: > { %s1240_s27 = sshll.u32 %s1558_s15, 7  ;;  %s2028_s22 = sld [smem:[#allocation26_spill]] }
 0x627   : > { %s1009_s9 = sshll.u32 %s540_s23, 4  ;;  %s2029_s30 = sand.u32 1, %s1546_s29   ;;  %s1010_s9 = int_to_ptr.vmem [resolvable:$true] %s1009_s9 }
 0x628   : > { %s991_s16 = scalar_lea.sflag [#allocation4], %s2029_s30  ;;  %s1420_s17 = scalar_lea.vmem %s1010_s9, 128 }
 0x629   : > { %p1421_p9 = scmp.ne.s32.totalorder %s1010_s9, %s1420_s17  ;;  %s1575_s28 = smov [#allocation3]  }
 0x62a   : > { %s1424_s0 = sshll.u32 %s1575_s28, 4  ;;  %s1425_s0 = int_to_ptr.vmem [resolvable:$false] %s1424_s0 }
 0x62b   : > { %p1422_p10 = pnand %p1421_p9, %p1718_p3  ;;  %s1426_s1 = scalar_lea.vmem %s1425_s0, 256 }
 0x62c   : > { %s1877_s19 = scalar_lea.hbm %s2028_s22, %s1240_s27  ;;  %p1427_p0 = scmp.lt.s32.totalorder %s1010_s9, %s1425_s0 }
 0x62d   : > { %p1423_p11 = pneg %p1422_p10  ;;  %p1428_p1 = scmp.lt.s32.totalorder %s1426_s1, %s1420_s17 }
 0x62f   : > { %p1429_p4 = por %p1428_p1, %p1427_p0 }
 0x631   : > { %p1430_p2 = pnand %p1429_p4, %p1423_p11 }
 0x633   : > { %1433 = shalt.err (!%p1430_p2)
}
 0x634   : > { %s1434_s11 = scalar_lea.hbm %s1877_s19, 128  ;;  %s1438_s28 = scalar_lea.hbm %s2028_s22, 256 }
 0x635   : > { %p1435_p5 = scmp.ne.s32.totalorder %s1877_s19, %s1434_s11  ;;  %p1439_p9 = scmp.lt.u32.totalorder %s1877_s19, %s2028_s22 }
 0x636   : > { %p1440_p10 = scmp.lt.u32.totalorder %s1438_s28, %s1434_s11  ;;  %p1442_p0 = scmp.lt.u32.totalorder %s1434_s11, %s1877_s19 }
 0x637   : > { %p1436_p6 = pnand %p1435_p5, %p1718_p3 }
 0x638   : > { %p1441_p11 = por %p1440_p10, %p1439_p9 }
 0x639   : > { %p1437_p8 = pneg %p1436_p6 }
 0x63a   : > { %p1443_p1 = por %p1442_p0, %p1441_p11 }
 0x63c   : > { %p1444_p4 = pnand %p1443_p1, %p1437_p8 }
 0x63e   : > { %1447 = shalt.err (!%p1444_p4)
}
 0x63f   : > { %1305 = dma.vmem_to_hbm [thread:$0]  (%p1718_p3), %s1010_s9, 128, %s1877_s19, %s991_s16  }
 0x640   : > { %s1241_s1 = sshll.u32 %s1558_s15, 2  ;;  %s2030_s24 = scalar_lea.vmem [#allocation5], %s1846_s12 }
 0x641   : > { %s1024_s30 = sshll.u32 %s2030_s24, 4  ;;  %s1020_s17 = sadd.s32 %s1554_s14, %s1241_s1  ;;  %s1904_s30 = int_to_ptr.vmem [resolvable:$true] %s1024_s30 }
 0x642   : > { %s1242_s11 = sshll.u32 %s1020_s17, 6  ;;  %s2031_s20 = sld [smem:[#allocation27_spill]] }
 0x643   : > { %s2032_s27 = sand.u32 1, %s1534_s26   ;;  %s1448_s2 = scalar_lea.vmem %s1904_s30, 64 }
 0x644   : > { %s996_s0 = scalar_lea.sflag [#allocation6], %s2032_s27  ;;  %p1449_p2 = scmp.ne.s32.totalorder %s1904_s30, %s1448_s2 }
 0x645   : > { %s1576_s15 = smov [#allocation5]  }
 0x646   : > { %p1450_p3 = pnand %p1449_p2, %p1747_p12  ;;  %s1452_s12 = sshll.u32 %s1576_s15, 4  ;;  %s1453_s12 = int_to_ptr.vmem [resolvable:$false] %s1452_s12 }
 0x647   : > { %s1454_s14 = scalar_lea.vmem %s1453_s12, 128  ;;  %p1455_p6 = scmp.lt.s32.totalorder %s1904_s30, %s1453_s12 }
 0x648   : > { %s1022_s28 = scalar_lea.hbm %s2031_s20, %s1242_s11  ;;  %p1451_p5 = pneg %p1450_p3 }
 0x649   : > { %p1456_p8 = scmp.lt.s32.totalorder %s1454_s14, %s1448_s2 }
 0x64b   : > { %p1457_p9 = por %p1456_p8, %p1455_p6 }
 0x64d   : > { %p1458_p10 = pnand %p1457_p9, %p1451_p5 }
 0x64f   : > { %1461 = shalt.err (!%p1458_p10)
}
 0x650   : > { %s1462_s19 = scalar_lea.hbm %s1022_s28, 64  ;;  %s1466_s1 = scalar_lea.hbm %s2031_s20, 512 }
 0x651   : > { %p1463_p11 = scmp.ne.s32.totalorder %s1022_s28, %s1462_s19  ;;  %p1467_p4 = scmp.lt.u32.totalorder %s1022_s28, %s2031_s20 }
 0x652   : > { %p1468_p2 = scmp.lt.u32.totalorder %s1466_s1, %s1462_s19  ;;  %p1470_p13 = scmp.lt.u32.totalorder %s1462_s19, %s1022_s28 }
 0x653   : > { %p1464_p0 = pnand %p1463_p11, %p1747_p12 }
 0x654   : > { %p1469_p3 = por %p1468_p2, %p1467_p4 }
 0x655   : > { %p1465_p1 = pneg %p1464_p0 }
 0x656   : > { %p1471_p6 = por %p1470_p13, %p1469_p3 }
 0x658   : > { %p1472_p5 = pnand %p1471_p6, %p1465_p1 }
 0x65a   : > { %1475 = shalt.err (!%p1472_p5)
}
 0x65b   : > { %1306 = dma.vmem_to_hbm [thread:$0]  (%p1747_p12), %s1904_s30, 64, %s1022_s28, %s996_s0  }
 0x65c PF: > { %s2033_s2 = sld [smem:[#allocation10_spill]]  ;;  %p1316_p8 = scmp.ge.s32.totalorder %s1570_s18, 2 }
 0x65e   : > { %p1310_p9 = pnand %p1316_p8, %p1735_p7 }
 0x662   : > { %s1036_s11 = sand.u32 1, %s2033_s2  }
 0x663   : > { %s1037_s21 = scalar_lea.sflag [#allocation4], %s1036_s11 }
 0x664   : > { %1521 = dma.done.wait (!%p1310_p9), %s1037_s21, 128  }
 0x665   : > { %1523 = vsyncadd (!%p1310_p9), %s1037_s21, 4294967168  ;;  %s2034_s23 = sld [smem:[#allocation19_spill]]  ;;  %s1045_s27 = sand.u32 1, %s1530_s25  }
 0x666   : > { %s1046_s15 = scalar_lea.sflag [#allocation6], %s1045_s27 }
 0x66b   : > { %p2035_p13 = scmp.ne.s32.totalorder %s2034_s23, 0 }
 0x66d   : > { %p1313_p10 = pnand %p1316_p8, %p2035_p13 }
 0x66f   : > { %1525 = dma.done.wait (!%p1313_p10), %s1046_s15, 64  }
 0x670   : > { %1527 = vsyncadd (!%p1313_p10), %s1046_s15, 4294967232  ;;  %s30_s18 = sadd.s32 1, %s1570_s18   ;;  %s2036_s13 = sld [smem:[#allocation9_spill]] }
 0x671   : > { %p27_p12 = scmp.ge.s32.totalorder %s30_s18, 10   ;;  %s2037_s27 = sld [smem:[#allocation18_spill]] }
 0x672   : > { %s2038_s10 = sld [smem:[#allocation11_spill]]  ;;  %s2039_s30 = sld [smem:[#allocation17_spill]] }
 0x673   : > { %s2040_s14 = sld [smem:[#allocation12_spill]]  ;;  %s2041_s15 = sld [smem:[#allocation13_spill]] }
 0x674   : > { %s2042_s16 = sld [smem:[#allocation14_spill]]  ;;  %s2043_s17 = sld [smem:[#allocation16_spill]] }
 0x675   : > { %s2044_s25 = smov %s1534_s26  ;;  %s2046_s28 = smov %s1546_s29 }
 0x676   : > { %s2045_s26 = smov %s2036_s13  ;;  %29 = sbr.rel (!%p27_p12) target bundleno = 18 (0x12), region = 149 }
 0x678   : > { %s2047_s29 = smov %s2038_s10 }
 0x67d   :  { %1051 = vsyncpa [#allocation4], 1 }
 0x67e   :  { %1053 = vsyncpa [#allocation4 + $0x1], 1 }
 0x67f   :  { %1054 = vsyncpa [#allocation6], 1 }
 0x680   :  { %1056 = vsyncpa [#allocation6 + $0x1], 1 }

// kernel: tpu_custom_call.1
= control target key start
LH: loop header
LB: loop body
LE: loop exit
PB: predicated region body
PF: predicated region fallthrough
CT: control target
= control target key end

     0   :  { %s1967_s0 = inlined_call_operand.vmem [shape: f32[2,8,32], index: 0, kind: input, shape index: {}]   ;;  %s1968_s1 = inlined_call_operand.vmem [shape: bf16[4,32,8], index: 1, kind: input, shape index: {}]   ;;  %s1969_s2 = inlined_call_operand.vmem [shape: f32[4,1,8], index: 2, kind: input, shape index: {}]   ;;  %s1970_s3 = inlined_call_operand.vmem [shape: bf16[4,32,8], index: 3, kind: input, shape index: {}]   ;;  %s1971_s4 = inlined_call_operand.vmem [shape: f32[4,1,8], index: 4, kind: input, shape index: {}]   ;;  %s1972_s5 = inlined_call_operand.vmem [shape: bf16[4,32,8], index: 5, kind: input, shape index: {}]   ;;  %s1973_s6 = inlined_call_operand.vmem [shape: f32[4,1,8], index: 6, kind: input, shape index: {}]   ;;  %s1974_s7 = inlined_call_operand.vmem [shape: f32[8,8], index: 7, kind: input, shape index: {}]   ;;  %s1975_s8 = inlined_call_operand.vmem [shape: bf16[4,8,32], index: 8, kind: input, shape index: {}]   ;;  %s1976_s9 = inlined_call_operand.vmem [shape: f32[1,32], index: 9, kind: input, shape index: {}]   ;;  %s1977_s10 = inlined_call_operand.vmem [shape: f32[1,32], index: 10, kind: input, shape index: {}]   ;;  %s1978_s11 = inlined_call_operand.vmem [shape: f32[1,32], index: 11, kind: input, shape index: {}]   ;;  %s1979_s12 = inlined_call_operand.hbm [shape: f32[2,8,32], index: 12, kind: output, shape index: {0}]   ;;  %s1980_s13 = inlined_call_operand.hbm [shape: bf16[2,4,8,8], index: 13, kind: output, shape index: {1}]  }
   0x1   :  { %1996 = sst [smem:[#allocation20_spill]] %s1967_s0 }
   0x2   :  { %1997 = sst [smem:[#allocation21_spill]] %s1968_s1 }
   0x3   :  { %1998 = sst [smem:[#allocation22_spill]] %s1969_s2 }
   0x4   :  { %1999 = sst [smem:[#allocation23_spill]] %s1976_s9 }
   0x5   :  { %2000 = sst [smem:[#allocation24_spill]] %s1977_s10 }
   0x6   :  { %2001 = sst [smem:[#allocation25_spill]] %s1978_s11 }
   0x7   :  { %2002 = sst [smem:[#allocation26_spill]] %s1979_s12 }
   0x8   :  { %2003 = sst [smem:[#allocation27_spill]] %s1980_s13 }
   0x9   :  { %19 = vsyncpa [#allocation4], 0 }
   0xa   :  { %21 = vsyncpa [#allocation4 + $0x1], 0 }
   0xb   :  { %22 = vsyncpa [#allocation6], 0 }
   0xc   :  { %24 = vsyncpa [#allocation6 + $0x1], 0  ;;  %s1647_s25 = smov 0   ;;  %s1649_s26 = smov 0  }
   0xd   :  { %s1651_s27 = smov 0   ;;  %s1653_s28 = smov 0  }
   0xe   :  { %s1655_s29 = smov 0   ;;  %s1657_s30 = smov 0  }
   0xf   :  { %s1659_s14 = smov 0   ;;  %s1661_s15 = smov 0  }
  0x10   :  { %s1663_s16 = smov 0   ;;  %s1665_s17 = smov 0  }
  0x11   :  { %s1667_s18 = smov 0  }
  0x12 LB: > { %2004 = sst [smem:[#allocation9_spill]] %s1538_s27  ;;  %s1203_s19 = sadd.s32 4294967295, %s1570_s18   ;;  %s1570_s18 = sphi %s1667_s18, %s30_s18   ;;  %s1566_s17 = sphi %s1665_s17, %s2043_s17   ;;  %s1562_s16 = sphi %s1663_s16, %s2042_s16   ;;  %s1558_s15 = sphi %s1661_s15, %s2041_s15   ;;  %s1554_s14 = sphi %s1659_s14, %s2040_s14   ;;  %s1550_s30 = sphi %s1657_s30, %s2039_s30   ;;  %s1546_s29 = sphi %s1655_s29, %s2047_s29   ;;  %s1542_s28 = sphi %s1653_s28, %s2046_s28   ;;  %s1538_s27 = sphi %s1651_s27, %s2037_s27   ;;  %s1534_s26 = sphi %s1649_s26, %s2045_s26   ;;  %s1530_s25 = sphi %s1647_s25, %s2044_s25  }
  0x13   : > { %2005 = sst [smem:[#allocation10_spill]] %s1542_s28  ;;  %s1204_s20 = sadd.s32 4294967294, %s1570_s18  }
  0x14   : > { %2006 = sst [smem:[#allocation11_spill]] %s1550_s30  ;;  %s39_s21 = sadd.s32 1, %s1562_s16 }
  0x15   : > { %2007 = sst [smem:[#allocation12_spill]] %s1562_s16  ;;  %s42_s22 = sadd.s32 1, %s1566_s17 }
  0x16   : > { %2008 = sst [smem:[#allocation13_spill]] %s1566_s17  ;;  %p40_p0 = scmp.ge.s32.totalorder %s39_s21, 4 }
  0x17   : > { %s341_s23 = sadd.s32 1, %s1550_s30  ;;  %p351_p1 = scmp.ne.s32.totalorder %s1550_s30, %s1546_s29 }
  0x18   : > { %p1709_p2 = scmp.eq.s32.totalorder %s1203_s19, 7  ;;  %s2049_s21 = smov (%p40_p0, %s39_s21), 0 }
  0x19   : > { %2010 = sst [smem:[#allocation14_spill]] %s2049_s21  ;;  %s2051_s22 = smov (!%p40_p0, %s42_s22), %s1566_s17 }
  0x1a   : > { %p1718_p3 = por %p1709_p2, %p351_p1  ;;  %p357_p4 = scmp.ne.s32.totalorder %s1546_s29, %s1542_s28 }
  0x1b   : > { %p44_p5 = scmp.ge.s32.totalorder %s2051_s22, 2  ;;  %p1724_p6 = scmp.eq.s32.totalorder %s1204_s20, 7 }
  0x1c   : > { %s2011_s13 = scalar_select %p1718_p3, 1, 0 }
  0x1d   : > { %s365_s12 = ssub.s32 %s1562_s16, %s2049_s21  ;;  %s369_s11 = sadd.s32 1, %s1538_s27 }
  0x1e   : > { %2012 = sst [smem:[#allocation15_spill]] %s2011_s13  ;;  %s2053_s22 = smov (%p44_p5, %s2051_s22), 0 }
  0x1f   : > { %2014 = sst [smem:[#allocation16_spill]] %s2053_s22  ;;  %p1735_p7 = por %p1724_p6, %p357_p4 }
  0x20   : > { %p379_p8 = scmp.ne.s32.totalorder %s1538_s27, %s1534_s26  ;;  %s338_s28 = ssub.s32 %s1566_s17, %s2053_s22 }
  0x21   : > { %p385_p9 = scmp.ne.s32.totalorder %s1534_s26, %s1530_s25  ;;  %p339_p10 = scmp.eq.s32.totalorder %s338_s28, 0 }
  0x22   : > { %s366_s20 = sor.u32 %s365_s12, %s338_s28  ;;  %p1747_p12 = por %p379_p8, %p1709_p2 }
  0x23   : > { %p367_p11 = scmp.eq.s32.totalorder %s366_s20, 0  ;;  %p1759_p13 = por %p385_p9, %p1724_p6 }
  0x24   : > { %s1752_s21 = scalar_select %p339_p10, %s1550_s30, %s341_s23  }
  0x25   : > { %s1755_s16 = scalar_select %p367_p11, %s1538_s27, %s369_s11  }
  0x26   : > { %2017 = sst [smem:[#allocation17_spill]] %s1752_s21  ;;  %p1207_p0 = scmp.ge.s32.totalorder %s1570_s18, 1 }
  0x27   : > { %2018 = sst [smem:[#allocation18_spill]] %s1755_s16  ;;  %p472_p1 = scmp.lt.s32.totalorder %s1570_s18, 9 }
  0x28   : > { %s2019_s9 = scalar_select %p1759_p13, 1, 0 }
  0x29   : > { %p473_p4 = pnand %p1207_p0, %p472_p1 }
  0x2a   : > { %2020 = sst [smem:[#allocation19_spill]] %s2019_s9  ;;  %p552_p2 = scmp.lt.s32.totalorder (!%p473_p4), %s1554_s14, 3  ;;  %v1572_v0 = vmov (!%p473_p4), 0.0   ;;  %vm1573_vm0 = vmmov (!%p473_p4), 0   ;;  %vm606_vm1 = vcmask (!%p473_p4), 261120   ;;  %vm780_vm2 = vcmask (!%p473_p4), 64512  }
  0x2b   : > { %476 = sbr.rel (%p473_p4) target bundleno = 1628 (0x65c), region = 68  ;;  %s1988_s12 = sand.u32 (!%p473_p4), 1, %s1546_s29   ;;  %1271 = vmatprep.subr.bf16.mxu1 (!%p473_p4), %v1572_v0  ;;  %1263 = vmatprep.subr.bf16.mxu0 (!%p473_p4), %v1572_v0  ;;  %v779_v24 = vld [vmem:[%s1974_s7] sm:$0xff] (!%p473_p4)  ;;  %vm844_vm3 = vcmask (!%p473_p4), 1043456   ;;  %vm839_vm4 = vcmask (!%p473_p4), 60416  }
  0x2c   : > { %s1770_s11 = sshll.u32 (!%p473_p4), %s1988_s12, 3  ;;  %1275 = vmatprep.mubr.msk.bf16.mxu1 (!%p473_p4), %vm1573_vm0, %v1572_v0  ;;  %1267 = vmatprep.mubr.msk.bf16.mxu0 (!%p473_p4), %vm1573_vm0, %v1572_v0  ;;  %p548_p5 = scmp.lt.s32.totalorder (!%p473_p4), %s1558_s15, 1 }
  0x2d   : > { %s2021_s1 = sld [smem:[#allocation21_spill]] (!%p473_p4)  ;;  %s2022_s0 = sld [smem:[#allocation20_spill]] (!%p473_p4) }
  0x2e   : > { %s2023_s2 = sld [smem:[#allocation22_spill]] (!%p473_p4)  ;;  %p1233_p6 = scmp.ne.s32.totalorder (!%p473_p4), %s1554_s14, 0 }
  0x32   : > { %s1774_s28 = scalar_select %p552_p2, %s1554_s14, 3 }
  0x33   : > { %s549_s21 = scalar_select %p548_p5, %s1558_s15, 1 }
  0x34   : > { %s1245_s23 = sshll.u32 %s1774_s28, 4  ;;  %s567_s16 = scalar_lea.vmem %s1971_s4, %s1774_s28  ;;  %v1574_v59 = vmov (!%p1233_p6), 0.0  }
  0x35   : > { %s564_s20 = scalar_lea.vmem %s1970_s3, %s1245_s23  ;;  %s556_s17 = scalar_lea.vmem %s2021_s1, %s1245_s23  ;;  %v1222_v7 = vld [vmem:[%s567_s16] ss:$0 sm:$0xff]  ;;  %940 = vst.msk [vmem:[#allocation2] sm:$0xff] (!%p1233_p6), %vm606_vm1, %v1574_v59 }
  0x36   : > { %v1408_v1 = vld [vmem:[%s564_s20] sm:$0xff]   ;;  %v1409_v2 = vld [vmem:[%s564_s20 + $0x8] sm:$0xff]   ;;  %s1792_s27 = scalar_lea.vmem %s1972_s5, %s1245_s23  ;;  %s1210_s9 = sshll.u32 %s549_s21, 3 }
  0x37   : > { %1272 = vmatpush3.bf16.msra.mxu1 %v1408_v1  ;;  %v1410_v3 = vld [vmem:[%s556_s17] sm:$0xff]   ;;  %v1411_v4 = vld [vmem:[%s556_s17 + $0x8] sm:$0xff]   ;;  %s1798_s22 = scalar_lea.vmem %s2022_s0, %s1210_s9  ;;  %s559_s12 = scalar_lea.vmem %s2023_s2, %s1774_s28 }
  0x38   : > { %1273 = vmatprep.subr.bf16.mxu1 %v1572_v0  ;;  %1264 = vmatpush3.bf16.msra.mxu0 %v1410_v3  ;;  %v581_v5 = vld [vmem:[%s1798_s22] sm:$0xff]  ;;  %v1413_v23 = vld [vmem:[%s1792_s27 + $0x8] sm:$0xff]   ;;  %s575_s19 = scalar_lea.vmem %s1973_s6, %s1774_s28  ;;  %s1217_s9 = sshll.u32 %s1774_s28, 2 }
  0x39   : > { %1265 = vmatprep.subr.bf16.mxu0 %v1572_v0  ;;  %v582_v6 = vpack.c.bf16 %v581_v5, %v581_v5  ;;  %v1218_v12 = vld [vmem:[%s559_s12] ss:$0 sm:$0xff]  ;;  %s579_s17 = scalar_lea.vmem %s1975_s8, %s1217_s9  ;;  %s1994_s21 = sand.u32 1, %s1534_s26  }
  0x3a   : > { %v1412_v22 = vld [vmem:[%s1792_s27] sm:$0xff]   ;;  %s1846_s12 = sshll.u32 %s1994_s21, 2  ;;  %s540_s23 = scalar_lea.vmem [#allocation3], %s1770_s11 }
  0x3b   : > { %1274 = vmatpush3.bf16.msra.mxu1 %v1409_v2  ;;  %v1226_v39 = vld [vmem:[%s575_s19] ss:$0 sm:$0xff]  ;;  %s1995_s28 = scalar_lea.vmem [#allocation5], %s1846_s12 }
  0x3c   : > { %1287 = vmatprep.subr.bf16.mxu1 %v1572_v0  ;;  %1266 = vmatpush3.bf16.msra.mxu0 %v1411_v4  ;;  %v889_v44 = vld [vmem:[%s579_s17] sm:$0xf] }
  0x3d   : > { %1279 = vmatprep.subr.bf16.mxu0 %v1572_v0  ;;  %v894_v45 = vsel %vm844_vm3, %v889_v44, 0 }
  0x3e   : > { %1276 = vmatmul.mubr.msk.bf16.vlgmr.msra.gmra.mrb[0].mxu1 %vm606_vm1, %v582_v6 }
  0x3f   : > { %1289 = vmatprep.mubr.msk.bf16.mxu1 %vm1573_vm0, %v1572_v0  ;;  %1268 = vmatmul.mubr.msk.bf16.vlgmr.msra.gmra.mrb[0].mxu0 %vm606_vm1, %v582_v6 }
  0x40   : > { %1283 = vmatprep.mubr.msk.bf16.mxu0 %vm1573_vm0, %v1572_v0  ;;  %1280 = vmatpush3.bf16.msra.mxu0 %v1412_v22 }
  0x41   : > { %1281 = vmatprep.subr.bf16.mxu0 %v1572_v0 }
  0x44   : > { %1282 = vmatpush3.bf16.msra.mxu0 %v1413_v23 }
  0x45   : > { %1293 = vmatprep.subr.bf16.mxu0 %v1572_v0 }
  0x47   : > { %1284 = vmatmul.mubr.msk.bf16.vlgmr.msra.gmra.mrb[4].mxu0 %vm606_vm1, %v582_v6 }
  0x48   : > { %1295 = vmatprep.mubr.msk.bf16.mxu0 %vm1573_vm0, %v1572_v0 }
 0x111   : > { %v708_v8 = vpop.f32.mrb[0].mxu1 }
 0x112   : > { %v709_v9 = vadd.f32 %v1222_v7, %v708_v8  ;;  %v1277_v10 = vpop.f32.mrb[1].mxu1  ;;  %v644_v13 = vpop.f32.mrb[0].mxu0 }
 0x113   : > { %v711_v11 = vpop.f32.mrb[2].mxu1  ;;  %v1269_v16 = vpop.f32.mrb[1].mxu0  ;;  %v645_v19 = vadd.f32 %v1218_v12, %v644_v13 }
 0x114   : > { %v714_v14 = vpack.c.bf16 %v709_v9, %v709_v9  ;;  %v1278_v15 = vpop.f32.mrb[3].mxu1  ;;  %v647_v17 = vpop.f32.mrb[2].mxu0 }
 0x115   : > { %v1270_v20 = vpop.f32.mrb[3].mxu0  ;;  %v650_v21 = vpack.c.bf16 %v645_v19, %v645_v19 }
 0x116   : > { %v785_v18 = vsel %vm780_vm2, %v714_v14, 0 }
 0x117   : > { %1288 = vmatpush3.bf16.xpose.msra.mxu1 %v785_v18 }
 0x118   : > { %1299 = vmatprep.subr.bf16.mxu1 %v1572_v0 }
 0x11a   : > { %v772_v36 = vpop.f32.mrb[4].mxu0 }
 0x11b   : > { %v1285_v37 = vpop.f32.mrb[5].mxu0  ;;  %v773_v41 = vadd.f32 %v1226_v39, %v772_v36 }
 0x11c   : > { %v775_v38 = vpop.f32.mrb[6].mxu0 }
 0x11d   : > { %v1286_v40 = vpop.f32.mrb[7].mxu0  ;;  %v778_v42 = vpack.c.bf16 %v773_v41, %v773_v41 }
 0x11e   : > { %1290 = vmatmul.mubr.msk.bf16.vlgmr.msra.gmra.mrb[4].mxu1 %vm780_vm2, %v650_v21 }
 0x11f   : > { %1301 = vmatprep.mubr.msk.bf16.mxu1 %vm1573_vm0, %v1572_v0  ;;  %v846_v43 = vsel %vm844_vm3, %v778_v42, 0  ;;  %1300 = vmatpush3.bf16.msra.mxu1 %v894_v45 }
 0x120   : > { %1294 = vmatpush3.bf16.msra.mxu0 %v846_v43 }
 0x1f1   : > { %v821_v25 = vpop.f32.mrb[4].mxu1 }
 0x1f2   : > { %v822_v26 = vadd.f32 %v821_v25, %v779_v24  ;;  %v1291_v27 = vpop.f32.mrb[5].mxu1 }
 0x1f3   : > { %v824_v28 = vpop.f32.mrb[6].mxu1 }
 0x1f4   : > { %v1292_v29 = vpop.f32.mrb[7].mxu1  ;;  %v827_v30 = vsel %vm780_vm2, %v822_v26, -inf }
 0x1f5   : > { %828 = vmax.xlane.f32.xlu0 %v827_v30 }
 0x282   : > { %v829_v31 = vpop.xlane.xlu0 %828 }
 0x283   : > { %v830_v32 = vsub.f32 %v822_v26, %v829_v31 }
 0x285   : > { %v831_v33 = vmul.f32 1.442695, %v830_v32 }
 0x287   : > { %1414 = vpow2.f32 %v831_v33 }
 0x291   : > { %v1415_v34 = vpop.eup %1414 }
 0x292   : > { %v833_v35 = vsel %vm780_vm2, %v1415_v34, 0.0 }
 0x293   : > { %834 = vadd.xlane.f32.xlu0 %v833_v35 }
 0x320   : > { %v835_v46 = vpop.xlane.xlu0 %834 }
 0x321   : > { %1416 = vrcp.f32 %v835_v46 }
 0x32b   : > { %v1417_v47 = vpop.eup %1416 }
 0x32c   : > { %v837_v48 = vmul.f32 %v1417_v47, %v1415_v34 }
 0x32e   : > { %v838_v49 = vpack.c.bf16 %v837_v48, %v837_v48 }
 0x330   : > { %840 = vst.msk [vmem:[%s1995_s28] sm:$0xf] %vm839_vm4, %v838_v49  ;;  %1296 = vmatmul.mubr.msk.bf16.vlgmr.msra.gmra.mrb[8].mxu0 %vm780_vm2, %v838_v49 }
 0x403   : > { %v882_v50 = vpop.f32.mrb[8].mxu0 }
 0x404   : > { %v888_v51 = vpack.c.bf16 %v882_v50, %v882_v50  ;;  %v1297_v52 = vpop.f32.mrb[9].mxu0 }
 0x405   : > { %v885_v53 = vpop.f32.mrb[10].mxu0 }
 0x406   : > { %v1298_v54 = vpop.f32.mrb[11].mxu0  ;;  %1302 = vmatmul.mubr.msk.bf16.vlgmr.msra.gmra.mrb[8].mxu1 %vm780_vm2, %v888_v51 }
 0x4d6   : > { %939 = sbr.rel (%p1233_p6) target bundleno = 1245 (0x4dd), region = 72 }
 0x4d9   : > { %v930_v55 = vpop.f32.mrb[8].mxu1 }
 0x4da   : > { %v1303_v56 = vpop.f32.mrb[9].mxu1 }
 0x4db   : > { %v933_v57 = vpop.f32.mrb[10].mxu1 }
 0x4dc   : > { %v1304_v58 = vpop.f32.mrb[11].mxu1 }
 0x4dd PF: > { %v941_v60 = vld [vmem:[#allocation2] sm:$0xff]  ;;  %p1234_p8 = scmp.ne.s32.totalorder %s1554_s14, 3 }
 0x4de   : > { %v942_v61 = vadd.f32 %v941_v60, %v930_v55  ;;  %v948_v62 = vld [vmem:[%s1798_s22] sm:$0xff] (!%p1234_p8)  ;;  %s2024_s24 = sld [smem:[#allocation23_spill]] (!%p1234_p8)  ;;  %s2025_s9 = sld [smem:[#allocation24_spill]] (!%p1234_p8) }
 0x4df   : > { %947 = sbr.rel (%p1234_p8) target bundleno = 1574 (0x626), region = 76  ;;  %s2026_s17 = sld [smem:[#allocation25_spill]] (!%p1234_p8) }
 0x4e0   : > { %943 = vst.msk [vmem:[#allocation2] sm:$0xff] %vm606_vm1, %v942_v61 }
 0x4e4   : > { %v1235_v0 = vld [vmem:[%s2024_s24] ss:$0 sm:$0xff] (!%p1234_p8) }
 0x4e5   : > { %v1236_v13 = vld [vmem:[%s2025_s9] ss:$0 sm:$0xff] (!%p1234_p8) }
 0x4e6   : > { %v1237_v15 = vld [vmem:[%s2026_s17] ss:$0 sm:$0xff] }
 0x4e7   : > { %v949_v63 = vld [vmem:[#allocation2] sm:$0xff] }
 0x4e8   : > { %v950_v1 = vadd.f32 %v949_v63, %v948_v62 }
 0x4ea   : > { %v958_v2 = vadd.f32 %v1235_v0, %v950_v1 }
 0x4ec   : > { %v959_v3 = vsel %vm606_vm1, %v958_v2, 0.0 }
 0x4ed   : > { %960 = vadd.xlane.f32.xlu0 %v959_v3 }
 0x57a   : > { %v961_v4 = vpop.xlane.xlu0 %960 }
 0x57b   : > { %v963_v5 = vmul.f32 0.03125, %v961_v4 }
 0x57d   : > { %v964_v6 = vsub.f32 %v958_v2, %v963_v5 }
 0x57f   : > { %v965_v7 = vmul.f32 %v964_v6, %v964_v6 }
 0x581   : > { %v966_v8 = vsel %vm606_vm1, %v965_v7, 0.0 }
 0x582   : > { %967 = vadd.xlane.f32.xlu0 %v966_v8 }
 0x60f   : > { %v968_v9 = vpop.xlane.xlu0 %967 }
 0x610   : > { %v969_v10 = vmul.f32 0.03125, %v968_v9 }
 0x612   : > { %v970_v11 = vadd.f32 1e-05, %v969_v10 }
 0x614   : > { %1418 = vrsqrt.f32 %v970_v11 }
 0x61e   : > { %v1419_v12 = vpop.eup %1418 }
 0x61f   : > { %v972_v14 = vmul.f32 %v1419_v12, %v964_v6 }
 0x621   : > { %v980_v16 = vmul.f32 %v1236_v13, %v972_v14 }
 0x623   : > { %v988_v17 = vadd.f32 %v1237_v15, %v980_v16 }
 0x625   : > { %989 = vst.msk [vmem:[%s540_s23] sm:$0xff] %vm606_vm1, %v988_v17 }
 0x626 PF: > { %s1240_s27 = sshll.u32 %s1558_s15, 7  ;;  %s2028_s22 = sld [smem:[#allocation26_spill]] }
 0x627   : > { %s1009_s9 = sshll.u32 %s540_s23, 4  ;;  %s2029_s30 = sand.u32 1, %s1546_s29   ;;  %s1010_s9 = int_to_ptr.vmem [resolvable:$true] %s1009_s9 }
 0x628   : > { %s991_s16 = scalar_lea.sflag [#allocation4], %s2029_s30  ;;  %s1420_s17 = scalar_lea.vmem %s1010_s9, 128 }
 0x629   : > { %p1421_p9 = scmp.ne.s32.totalorder %s1010_s9, %s1420_s17  ;;  %s1575_s28 = smov [#allocation3]  }
 0x62a   : > { %s1424_s0 = sshll.u32 %s1575_s28, 4  ;;  %s1425_s0 = int_to_ptr.vmem [resolvable:$false] %s1424_s0 }
 0x62b   : > { %p1422_p10 = pnand %p1421_p9, %p1718_p3  ;;  %s1426_s1 = scalar_lea.vmem %s1425_s0, 256 }
 0x62c   : > { %s1877_s19 = scalar_lea.hbm %s2028_s22, %s1240_s27  ;;  %p1427_p0 = scmp.lt.s32.totalorder %s1010_s9, %s1425_s0 }
 0x62d   : > { %p1423_p11 = pneg %p1422_p10  ;;  %p1428_p1 = scmp.lt.s32.totalorder %s1426_s1, %s1420_s17 }
 0x62f   : > { %p1429_p4 = por %p1428_p1, %p1427_p0 }
 0x631   : > { %p1430_p2 = pnand %p1429_p4, %p1423_p11 }
 0x633   : > { %1433 = shalt.err (!%p1430_p2)
}
 0x634   : > { %s1434_s11 = scalar_lea.hbm %s1877_s19, 128  ;;  %s1438_s28 = scalar_lea.hbm %s2028_s22, 256 }
 0x635   : > { %p1435_p5 = scmp.ne.s32.totalorder %s1877_s19, %s1434_s11  ;;  %p1439_p9 = scmp.lt.u32.totalorder %s1877_s19, %s2028_s22 }
 0x636   : > { %p1440_p10 = scmp.lt.u32.totalorder %s1438_s28, %s1434_s11  ;;  %p1442_p0 = scmp.lt.u32.totalorder %s1434_s11, %s1877_s19 }
 0x637   : > { %p1436_p6 = pnand %p1435_p5, %p1718_p3 }
 0x638   : > { %p1441_p11 = por %p1440_p10, %p1439_p9 }
 0x639   : > { %p1437_p8 = pneg %p1436_p6 }
 0x63a   : > { %p1443_p1 = por %p1442_p0, %p1441_p11 }
 0x63c   : > { %p1444_p4 = pnand %p1443_p1, %p1437_p8 }
 0x63e   : > { %1447 = shalt.err (!%p1444_p4)
}
 0x63f   : > { %1305 = dma.vmem_to_hbm [thread:$0]  (%p1718_p3), %s1010_s9, 128, %s1877_s19, %s991_s16  }
 0x640   : > { %s1241_s1 = sshll.u32 %s1558_s15, 2  ;;  %s2030_s24 = scalar_lea.vmem [#allocation5], %s1846_s12 }
 0x641   : > { %s1024_s30 = sshll.u32 %s2030_s24, 4  ;;  %s1020_s17 = sadd.s32 %s1554_s14, %s1241_s1  ;;  %s1904_s30 = int_to_ptr.vmem [resolvable:$true] %s1024_s30 }
 0x642   : > { %s1242_s11 = sshll.u32 %s1020_s17, 6  ;;  %s2031_s20 = sld [smem:[#allocation27_spill]] }
 0x643   : > { %s2032_s27 = sand.u32 1, %s1534_s26   ;;  %s1448_s2 = scalar_lea.vmem %s1904_s30, 64 }
 0x644   : > { %s996_s0 = scalar_lea.sflag [#allocation6], %s2032_s27  ;;  %p1449_p2 = scmp.ne.s32.totalorder %s1904_s30, %s1448_s2 }
 0x645   : > { %s1576_s15 = smov [#allocation5]  }
 0x646   : > { %p1450_p3 = pnand %p1449_p2, %p1747_p12  ;;  %s1452_s12 = sshll.u32 %s1576_s15, 4  ;;  %s1453_s12 = int_to_ptr.vmem [resolvable:$false] %s1452_s12 }
 0x647   : > { %s1454_s14 = scalar_lea.vmem %s1453_s12, 128  ;;  %p1455_p6 = scmp.lt.s32.totalorder %s1904_s30, %s1453_s12 }
 0x648   : > { %s1022_s28 = scalar_lea.hbm %s2031_s20, %s1242_s11  ;;  %p1451_p5 = pneg %p1450_p3 }
 0x649   : > { %p1456_p8 = scmp.lt.s32.totalorder %s1454_s14, %s1448_s2 }
 0x64b   : > { %p1457_p9 = por %p1456_p8, %p1455_p6 }
 0x64d   : > { %p1458_p10 = pnand %p1457_p9, %p1451_p5 }
 0x64f   : > { %1461 = shalt.err (!%p1458_p10)
}
 0x650   : > { %s1462_s19 = scalar_lea.hbm %s1022_s28, 64  ;;  %s1466_s1 = scalar_lea.hbm %s2031_s20, 512 }
 0x651   : > { %p1463_p11 = scmp.ne.s32.totalorder %s1022_s28, %s1462_s19  ;;  %p1467_p4 = scmp.lt.u32.totalorder %s1022_s28, %s2031_s20 }
 0x652   : > { %p1468_p2 = scmp.lt.u32.totalorder %s1466_s1, %s1462_s19  ;;  %p1470_p13 = scmp.lt.u32.totalorder %s1462_s19, %s1022_s28 }
 0x653   : > { %p1464_p0 = pnand %p1463_p11, %p1747_p12 }
 0x654   : > { %p1469_p3 = por %p1468_p2, %p1467_p4 }
 0x655   : > { %p1465_p1 = pneg %p1464_p0 }
 0x656   : > { %p1471_p6 = por %p1470_p13, %p1469_p3 }
 0x658   : > { %p1472_p5 = pnand %p1471_p6, %p1465_p1 }
 0x65a   : > { %1475 = shalt.err (!%p1472_p5)
}
 0x65b   : > { %1306 = dma.vmem_to_hbm [thread:$0]  (%p1747_p12), %s1904_s30, 64, %s1022_s28, %s996_s0  }
 0x65c PF: > { %s2033_s2 = sld [smem:[#allocation10_spill]]  ;;  %p1316_p8 = scmp.ge.s32.totalorder %s1570_s18, 2 }
 0x65e   : > { %p1310_p9 = pnand %p1316_p8, %p1735_p7 }
 0x662   : > { %s1036_s11 = sand.u32 1, %s2033_s2  }
 0x663   : > { %s1037_s21 = scalar_lea.sflag [#allocation4], %s1036_s11 }
 0x664   : > { %1521 = dma.done.wait (!%p1310_p9), %s1037_s21, 128  }
 0x665   : > { %1523 = vsyncadd (!%p1310_p9), %s1037_s21, 4294967168  ;;  %s2034_s23 = sld [smem:[#allocation19_spill]]  ;;  %s1045_s27 = sand.u32 1, %s1530_s25  }
 0x666   : > { %s1046_s15 = scalar_lea.sflag [#allocation6], %s1045_s27 }
 0x66b   : > { %p2035_p13 = scmp.ne.s32.totalorder %s2034_s23, 0 }
 0x66d   : > { %p1313_p10 = pnand %p1316_p8, %p2035_p13 }
 0x66f   : > { %1525 = dma.done.wait (!%p1313_p10), %s1046_s15, 64  }
 0x670   : > { %1527 = vsyncadd (!%p1313_p10), %s1046_s15, 4294967232  ;;  %s30_s18 = sadd.s32 1, %s1570_s18   ;;  %s2036_s13 = sld [smem:[#allocation9_spill]] }
 0x671   : > { %p27_p12 = scmp.ge.s32.totalorder %s30_s18, 10   ;;  %s2037_s27 = sld [smem:[#allocation18_spill]] }
 0x672   : > { %s2038_s10 = sld [smem:[#allocation11_spill]]  ;;  %s2039_s30 = sld [smem:[#allocation17_spill]] }
 0x673   : > { %s2040_s14 = sld [smem:[#allocation12_spill]]  ;;  %s2041_s15 = sld [smem:[#allocation13_spill]] }
 0x674   : > { %s2042_s16 = sld [smem:[#allocation14_spill]]  ;;  %s2043_s17 = sld [smem:[#allocation16_spill]] }
 0x675   : > { %s2044_s25 = smov %s1534_s26  ;;  %s2046_s28 = smov %s1546_s29 }
 0x676   : > { %s2045_s26 = smov %s2036_s13  ;;  %29 = sbr.rel (!%p27_p12) target bundleno = 18 (0x12), region = 149 }
 0x678   : > { %s2047_s29 = smov %s2038_s10 }
 0x67d   :  { %1051 = vsyncpa [#allocation4], 1 }
 0x67e   :  { %1053 = vsyncpa [#allocation4 + $0x1], 1 }
 0x67f   :  { %1054 = vsyncpa [#allocation6], 1 }
 0x680   :  { %1056 = vsyncpa [#allocation6 + $0x1], 1 }

</bundles_post_ra>
